<compile_context>
chip_gen: v6e
topology: v6e:2x2x1
jax: 0.10.0
libtpu: 0.0.40
codegen_flags: <defaults>
</compile_context>

<pallas_src>
import functools

import jax
import jax.numpy as jnp
import numpy as np
from jax import lax
from jax.experimental import pallas as pl
from jax.experimental.pallas import tpu as pltpu


# ----------------------------- Pallas kernel ------------------------------- #

def _fused_rnn_kernel(x_ref, wih0_ref, whh0_ref, b0_ref,
                      wih1_ref, whh1_ref, b1_ref,
                      wfc_ref, bfc_ref,
                      out_ref,
                      xproj_ref,
                      *, seq_len, batch_pad):
    """Fused 2-layer tanh-RNN + FC.

    x_ref:    (T*B_pad, D_pad)   time-major, batch-padded, flattened input
    wih*_ref: (in_pad, H_pad)    input->hidden weights (pre-transposed, padded)
    whh*_ref: (H_pad, H_pad)     hidden->hidden weights (pre-transposed, padded)
    b*_ref:   (1, H_pad)         b_ih + b_hh (padded)
    wfc_ref:  (H_pad, O_pad), bfc_ref: (1, O_pad)
    out_ref:  (B_pad, O_pad)     FC output (only HBM writeback of the kernel)
    xproj_ref: (T*B_pad, H_pad)  VMEM scratch for layer-0 input projections
    """
    h_pad = whh0_ref.shape[1]

    # ---- Phase 0: layer-0 input projection for ALL timesteps (one MXU matmul) ----
    xproj_ref[...] = (
        jnp.dot(x_ref[...], wih0_ref[...], preferred_element_type=jnp.float32)
        + b0_ref[...]
    )

    # Hoist the loop-invariant layer-1 bias broadcast out of the recurrence.
    b1_full = jnp.broadcast_to(b1_ref[...], (batch_pad, h_pad))
    h_init = jnp.zeros((batch_pad, h_pad), jnp.float32)

    # ---- Phase 1: interleaved layer-0 / layer-1 recurrence ------------------------
    # Only h0_{t-1} @ W_hh0 and h1_{t-1} @ W_hh1 are on the sequential path; the
    # layer-1 input projection (h0_t @ W_ih1) overlaps with the next step's work.
    def step(t, carry):
        h0, h1 = carry
        row = pl.multiple_of(t * batch_pad, batch_pad)
        pre0 = xproj_ref[pl.ds(row, batch_pad), :] + jnp.dot(
            h0, whh0_ref[...], preferred_element_type=jnp.float32)
        h0_new = jnp.tanh(pre0)
        pre1 = (jnp.dot(h0_new, wih1_ref[...], preferred_element_type=jnp.float32)
                + b1_full
                + jnp.dot(h1, whh1_ref[...], preferred_element_type=jnp.float32))
        h1_new = jnp.tanh(pre1)
        return (h0_new, h1_new)

    _, h1_last = lax.fori_loop(0, seq_len, step, (h_init, h_init), unroll=True)

    # TODO(synk): inter-layer dropout (p=0.2) is training-only; omitted (eval semantics).

    # ---- Phase 2: final Linear on out[:, -1, :] -----------------------------------
    out_ref[...] = (
        jnp.dot(h1_last, wfc_ref[...], preferred_element_type=jnp.float32)
        + bfc_ref[...]
    ).astype(out_ref.dtype)


# ------------------------------ wrappers ------------------------------------ #

def _round_up(n, m):
    return ((n + m - 1) // m) * m


def _pad2d(a, rows, cols):
    a = jnp.asarray(a, jnp.float32)
    return jnp.zeros((rows, cols), jnp.float32).at[:a.shape[0], :a.shape[1]].set(a)


def init_params(key, input_size, hidden_size, output_size, num_layers):
    """PyTorch-shaped parameters, U(-k, k) with k = 1/sqrt(hidden_size)."""
    params = {"rnn": [], "fc": {}}
    k = 1.0 / float(np.sqrt(hidden_size))
    for layer in range(num_layers):
        d_in = input_size if layer == 0 else hidden_size
        key, k1, k2, k3, k4 = jax.random.split(key, 5)
        params["rnn"].append({
            "w_ih": jax.random.uniform(k1, (hidden_size, d_in), jnp.float32, -k, k),
            "w_hh": jax.random.uniform(k2, (hidden_size, hidden_size), jnp.float32, -k, k),
            "b_ih": jax.random.uniform(k3, (hidden_size,), jnp.float32, -k, k),
            "b_hh": jax.random.uniform(k4, (hidden_size,), jnp.float32, -k, k),
        })
    key, k1, k2 = jax.random.split(key, 3)
    params["fc"] = {
        "w": jax.random.uniform(k1, (output_size, hidden_size), jnp.float32, -k, k),
        "b": jax.random.uniform(k2, (output_size,), jnp.float32, -k, k),
    }
    return params


def prepare_params(params):
    """One-time prep: transpose, fuse biases, and pad to (8,128)-aligned shapes."""
    l0, l1 = params["rnn"]
    H = l0["w_hh"].shape[0]
    D = l0["w_ih"].shape[1]
    O = params["fc"]["w"].shape[0]
    D_pad, H_pad, O_pad = _round_up(D, 128), _round_up(H, 128), _round_up(O, 128)

    def prep_layer(lp, in_pad):
        wih = _pad2d(jnp.asarray(lp["w_ih"]).T, in_pad, H_pad)          # (in_pad, H_pad)
        whh = _pad2d(jnp.asarray(lp["w_hh"]).T, H_pad, H_pad)           # (H_pad, H_pad)
        b = _pad2d((jnp.asarray(lp["b_ih"]) + jnp.asarray(lp["b_hh"])).reshape(1, H),
                   1, H_pad)                                            # (1, H_pad)
        return wih, whh, b

    wih0, whh0, b0 = prep_layer(l0, D_pad)
    wih1, whh1, b1 = prep_layer(l1, H_pad)
    wfc = _pad2d(jnp.asarray(params["fc"]["w"]).T, H_pad, O_pad)
    bfc = _pad2d(jnp.asarray(params["fc"]["b"]).reshape(1, O), 1, O_pad)
    return {"wih0": wih0, "whh0": whh0, "b0": b0,
            "wih1": wih1, "whh1": whh1, "b1": b1,
            "wfc": wfc, "bfc": bfc}


@functools.partial(jax.jit, static_argnames=("out_dim",))
def rnn_forward(prepped, x, out_dim):
    """Equivalent of RNN.forward: x is (B, T, input_size), batch_first."""
    B, T, D = x.shape
    D_pad = prepped["wih0"].shape[0]
    H_pad = prepped["whh0"].shape[0]
    O_pad = prepped["wfc"].shape[1]
    B_pad = _round_up(B, 8)

    # batch_first (B,T,D) -> time-major, zero-padded, flattened (T*B_pad, D_pad).
    x_t = jnp.transpose(x.astype(jnp.float32), (1, 0, 2))
    x_flat = (jnp.zeros((T, B_pad, D_pad), jnp.float32)
              .at[:, :B, :D].set(x_t)
              .reshape(T * B_pad, D_pad))

    out_pad = pl.pallas_call(
        functools.partial(_fused_rnn_kernel, seq_len=T, batch_pad=B_pad),
        out_shape=jax.ShapeDtypeStruct((B_pad, O_pad), jnp.float32),
        in_specs=[pl.BlockSpec(memory_space=pltpu.MemorySpace.VMEM)] * 9,
        out_specs=pl.BlockSpec(memory_space=pltpu.MemorySpace.VMEM),
        scratch_shapes=[
            pltpu.VMEM((T * B_pad, H_pad), jnp.float32),   # layer-0 input projections
        ],
    )(x_flat,
      prepped["wih0"], prepped["whh0"], prepped["b0"],
      prepped["wih1"], prepped["whh1"], prepped["b1"],
      prepped["wfc"], prepped["bfc"])

    return out_pad[:B, :out_dim]


# ------------------------- pure-JAX reference (check) ----------------------- #

@jax.jit
def rnn_reference(params, x):
    h_seq = jnp.transpose(jnp.asarray(x, jnp.float32), (1, 0, 2))       # (T, B, D)
    B = x.shape[0]
    for lp in params["rnn"]:
        H = lp["w_hh"].shape[0]
        h_t = jnp.zeros((B, H), jnp.float32)
        outs = []
        for t in range(h_seq.shape[0]):
            h_t = jnp.tanh(h_seq[t] @ lp["w_ih"].T + lp["b_ih"]
                           + h_t @ lp["w_hh"].T + lp["b_hh"])
            outs.append(h_t)
        h_seq = jnp.stack(outs, axis=0)
    return h_seq[-1] @ params["fc"]["w"].T + params["fc"]["b"]


# --------------------------------- main ------------------------------------- #

if __name__ == "__main__":
    B, T = 2, 8
    input_size, hidden_size, output_size, num_layers = 16, 32, 8, 2

    key = jax.random.PRNGKey(0)
    key, pk, xk = jax.random.split(key, 3)
    params = init_params(pk, input_size, hidden_size, output_size, num_layers)
    prepped = prepare_params(params)
    x = jax.random.normal(xk, (B, T, input_size), jnp.float32)

    out = rnn_forward(prepped, x, out_dim=output_size)
    out = jax.block_until_ready(out)
    assert out.shape == (B, output_size), out.shape

    ref = jax.block_until_ready(rnn_reference(params, x))
    np.testing.assert_allclose(np.asarray(out), np.asarray(ref), rtol=2e-2, atol=2e-2)

    print("KERNEL_OK")
</pallas_src>

<mosaic_0001>
module attributes {stable_mosaic.version = 11 : i64} {
  func.func @_fused_rnn_kernel(%arg0: memref<64x128xf32, #tpu.memory_space<vmem>>, %arg1: memref<128x128xf32, #tpu.memory_space<vmem>>, %arg2: memref<128x128xf32, #tpu.memory_space<vmem>>, %arg3: memref<1x128xf32, #tpu.memory_space<vmem>>, %arg4: memref<128x128xf32, #tpu.memory_space<vmem>>, %arg5: memref<128x128xf32, #tpu.memory_space<vmem>>, %arg6: memref<1x128xf32, #tpu.memory_space<vmem>>, %arg7: memref<128x128xf32, #tpu.memory_space<vmem>>, %arg8: memref<1x128xf32, #tpu.memory_space<vmem>>, %arg9: memref<8x128xf32, #tpu.memory_space<vmem>>, %arg10: memref<64x128xf32, #tpu.memory_space<vmem>>) attributes {dimension_semantics = [], scalar_prefetch = 0 : i64, scratch_operands = 1 : i64, tpu.core_type = #tpu.core_type<tc>} {
    %c0 = arith.constant 0 : index
    %c0_0 = arith.constant 0 : index
    %0 = vector.load %arg0[%c0, %c0_0] : memref<64x128xf32, #tpu.memory_space<vmem>>, vector<64x128xf32>
    %c0_1 = arith.constant 0 : index
    %c0_2 = arith.constant 0 : index
    %1 = vector.load %arg1[%c0_1, %c0_2] : memref<128x128xf32, #tpu.memory_space<vmem>>, vector<128x128xf32>
    %cst = arith.constant dense<0.000000e+00> : vector<64x128xf32>
    %2 = tpu.matmul %0, %1, %cst {dimension_numbers = #tpu.dot_dimension_numbers<[1], [0], [0], [1], [0, 0, 1, 1], [], []>} : vector<64x128xf32>, vector<128x128xf32>, vector<64x128xf32> -> vector<64x128xf32>
    %c0_3 = arith.constant 0 : index
    %c0_4 = arith.constant 0 : index
    %3 = vector.load %arg3[%c0_3, %c0_4] : memref<1x128xf32, #tpu.memory_space<vmem>>, vector<1x128xf32>
    %4 = vector.broadcast %3 : vector<1x128xf32> to vector<64x128xf32>
    %5 = arith.addf %2, %4 : vector<64x128xf32>
    %c0_5 = arith.constant 0 : index
    %c0_6 = arith.constant 0 : index
    %6 = vector.load %arg10[%c0_5, %c0_6] : memref<64x128xf32, #tpu.memory_space<vmem>>, vector<64x128xf32>
    tpu.vector_store %arg10[%c0_5, %c0_6], %5 {strides = array<i32>} : memref<64x128xf32, #tpu.memory_space<vmem>>, vector<64x128xf32>,
    %c0_7 = arith.constant 0 : index
    %c0_8 = arith.constant 0 : index
    %7 = vector.load %arg6[%c0_7, %c0_8] : memref<1x128xf32, #tpu.memory_space<vmem>>, vector<1x128xf32>
    %8 = vector.shape_cast %7 : vector<1x128xf32> to vector<1x128xf32>
    %9 = vector.broadcast %8 : vector<1x128xf32> to vector<8x128xf32>
    %cst_9 = arith.constant 0.000000e+00 : f32
    %10 = vector.broadcast %cst_9 : f32 to vector<8x128xf32>
    %c0_i32 = arith.constant 0 : i32
    %c8_i32 = arith.constant 8 : i32
    %11 = arith.muli %c0_i32, %c8_i32 : i32
    %12 = tpu.assume_multiple %11, 8 : i32
    %13 = arith.index_cast %12 : i32 to index
    %c0_10 = arith.constant 0 : index
    %14 = vector.load %arg10[%13, %c0_10] : memref<64x128xf32, #tpu.memory_space<vmem>>, vector<8x128xf32>
    %c0_11 = arith.constant 0 : index
    %c0_12 = arith.constant 0 : index
    %15 = vector.load %arg2[%c0_11, %c0_12] : memref<128x128xf32, #tpu.memory_space<vmem>>, vector<128x128xf32>
    %cst_13 = arith.constant dense<0.000000e+00> : vector<8x128xf32>
    %16 = tpu.matmul %10, %15, %cst_13 {dimension_numbers = #tpu.dot_dimension_numbers<[1], [0], [0], [1], [0, 0, 1, 1], [], []>} : vector<8x128xf32>, vector<128x128xf32>, vector<8x128xf32> -> vector<8x128xf32>
    %17 = arith.addf %14, %16 : vector<8x128xf32>
    %18 = math.tanh %17 : vector<8x128xf32>
    %c0_14 = arith.constant 0 : index
    %c0_15 = arith.constant 0 : index
    %19 = vector.load %arg4[%c0_14, %c0_15] : memref<128x128xf32, #tpu.memory_space<vmem>>, vector<128x128xf32>
    %cst_16 = arith.constant dense<0.000000e+00> : vector<8x128xf32>
    %20 = tpu.matmul %18, %19, %cst_16 {dimension_numbers = #tpu.dot_dimension_numbers<[1], [0], [0], [1], [0, 0, 1, 1], [], []>} : vector<8x128xf32>, vector<128x128xf32>, vector<8x128xf32> -> vector<8x128xf32>
    %21 = arith.addf %20, %9 : vector<8x128xf32>
    %c0_17 = arith.constant 0 : index
    %c0_18 = arith.constant 0 : index
    %22 = vector.load %arg5[%c0_17, %c0_18] : memref<128x128xf32, #tpu.memory_space<vmem>>, vector<128x128xf32>
    %cst_19 = arith.constant dense<0.000000e+00> : vector<8x128xf32>
    %23 = tpu.matmul %10, %22, %cst_19 {dimension_numbers = #tpu.dot_dimension_numbers<[1], [0], [0], [1], [0, 0, 1, 1], [], []>} : vector<8x128xf32>, vector<128x128xf32>, vector<8x128xf32> -> vector<8x128xf32>
    %24 = arith.addf %21, %23 : vector<8x128xf32>
    %25 = math.tanh %24 : vector<8x128xf32>
    %c1_i32 = arith.constant 1 : i32
    %c8_i32_20 = arith.constant 8 : i32
    %26 = arith.muli %c1_i32, %c8_i32_20 : i32
    %27 = tpu.assume_multiple %26, 8 : i32
    %28 = arith.index_cast %27 : i32 to index
    %c0_21 = arith.constant 0 : index
    %29 = vector.load %arg10[%28, %c0_21] : memref<64x128xf32, #tpu.memory_space<vmem>>, vector<8x128xf32>
    %c0_22 = arith.constant 0 : index
    %c0_23 = arith.constant 0 : index
    %30 = vector.load %arg2[%c0_22, %c0_23] : memref<128x128xf32, #tpu.memory_space<vmem>>, vector<128x128xf32>
    %cst_24 = arith.constant dense<0.000000e+00> : vector<8x128xf32>
    %31 = tpu.matmul %18, %30, %cst_24 {dimension_numbers = #tpu.dot_dimension_numbers<[1], [0], [0], [1], [0, 0, 1, 1], [], []>} : vector<8x128xf32>, vector<128x128xf32>, vector<8x128xf32> -> vector<8x128xf32>
    %32 = arith.addf %29, %31 : vector<8x128xf32>
    %33 = math.tanh %32 : vector<8x128xf32>
    %c0_25 = arith.constant 0 : index
    %c0_26 = arith.constant 0 : index
    %34 = vector.load %arg4[%c0_25, %c0_26] : memref<128x128xf32, #tpu.memory_space<vmem>>, vector<128x128xf32>
    %cst_27 = arith.constant dense<0.000000e+00> : vector<8x128xf32>
    %35 = tpu.matmul %33, %34, %cst_27 {dimension_numbers = #tpu.dot_dimension_numbers<[1], [0], [0], [1], [0, 0, 1, 1], [], []>} : vector<8x128xf32>, vector<128x128xf32>, vector<8x128xf32> -> vector<8x128xf32>
    %36 = arith.addf %35, %9 : vector<8x128xf32>
    %c0_28 = arith.constant 0 : index
    %c0_29 = arith.constant 0 : index
    %37 = vector.load %arg5[%c0_28, %c0_29] : memref<128x128xf32, #tpu.memory_space<vmem>>, vector<128x128xf32>
    %cst_30 = arith.constant dense<0.000000e+00> : vector<8x128xf32>
    %38 = tpu.matmul %25, %37, %cst_30 {dimension_numbers = #tpu.dot_dimension_numbers<[1], [0], [0], [1], [0, 0, 1, 1], [], []>} : vector<8x128xf32>, vector<128x128xf32>, vector<8x128xf32> -> vector<8x128xf32>
    %39 = arith.addf %36, %38 : vector<8x128xf32>
    %40 = math.tanh %39 : vector<8x128xf32>
    %c2_i32 = arith.constant 2 : i32
    %c8_i32_31 = arith.constant 8 : i32
    %41 = arith.muli %c2_i32, %c8_i32_31 : i32
    %42 = tpu.assume_multiple %41, 8 : i32
    %43 = arith.index_cast %42 : i32 to index
    %c0_32 = arith.constant 0 : index
    %44 = vector.load %arg10[%43, %c0_32] : memref<64x128xf32, #tpu.memory_space<vmem>>, vector<8x128xf32>
    %c0_33 = arith.constant 0 : index
    %c0_34 = arith.constant 0 : index
    %45 = vector.load %arg2[%c0_33, %c0_34] : memref<128x128xf32, #tpu.memory_space<vmem>>, vector<128x128xf32>
    %cst_35 = arith.constant dense<0.000000e+00> : vector<8x128xf32>
    %46 = tpu.matmul %33, %45, %cst_35 {dimension_numbers = #tpu.dot_dimension_numbers<[1], [0], [0], [1], [0, 0, 1, 1], [], []>} : vector<8x128xf32>, vector<128x128xf32>, vector<8x128xf32> -> vector<8x128xf32>
    %47 = arith.addf %44, %46 : vector<8x128xf32>
    %48 = math.tanh %47 : vector<8x128xf32>
    %c0_36 = arith.constant 0 : index
    %c0_37 = arith.constant 0 : index
    %49 = vector.load %arg4[%c0_36, %c0_37] : memref<128x128xf32, #tpu.memory_space<vmem>>, vector<128x128xf32>
    %cst_38 = arith.constant dense<0.000000e+00> : vector<8x128xf32>
    %50 = tpu.matmul %48, %49, %cst_38 {dimension_numbers = #tpu.dot_dimension_numbers<[1], [0], [0], [1], [0, 0, 1, 1], [], []>} : vector<8x128xf32>, vector<128x128xf32>, vector<8x128xf32> -> vector<8x128xf32>
    %51 = arith.addf %50, %9 : vector<8x128xf32>
    %c0_39 = arith.constant 0 : index
    %c0_40 = arith.constant 0 : index
    %52 = vector.load %arg5[%c0_39, %c0_40] : memref<128x128xf32, #tpu.memory_space<vmem>>, vector<128x128xf32>
    %cst_41 = arith.constant dense<0.000000e+00> : vector<8x128xf32>
    %53 = tpu.matmul %40, %52, %cst_41 {dimension_numbers = #tpu.dot_dimension_numbers<[1], [0], [0], [1], [0, 0, 1, 1], [], []>} : vector<8x128xf32>, vector<128x128xf32>, vector<8x128xf32> -> vector<8x128xf32>
    %54 = arith.addf %51, %53 : vector<8x128xf32>
    %55 = math.tanh %54 : vector<8x128xf32>
    %c3_i32 = arith.constant 3 : i32
    %c8_i32_42 = arith.constant 8 : i32
    %56 = arith.muli %c3_i32, %c8_i32_42 : i32
    %57 = tpu.assume_multiple %56, 8 : i32
    %58 = arith.index_cast %57 : i32 to index
    %c0_43 = arith.constant 0 : index
    %59 = vector.load %arg10[%58, %c0_43] : memref<64x128xf32, #tpu.memory_space<vmem>>, vector<8x128xf32>
    %c0_44 = arith.constant 0 : index
    %c0_45 = arith.constant 0 : index
    %60 = vector.load %arg2[%c0_44, %c0_45] : memref<128x128xf32, #tpu.memory_space<vmem>>, vector<128x128xf32>
    %cst_46 = arith.constant dense<0.000000e+00> : vector<8x128xf32>
    %61 = tpu.matmul %48, %60, %cst_46 {dimension_numbers = #tpu.dot_dimension_numbers<[1], [0], [0], [1], [0, 0, 1, 1], [], []>} : vector<8x128xf32>, vector<128x128xf32>, vector<8x128xf32> -> vector<8x128xf32>
    %62 = arith.addf %59, %61 : vector<8x128xf32>
    %63 = math.tanh %62 : vector<8x128xf32>
    %c0_47 = arith.constant 0 : index
    %c0_48 = arith.constant 0 : index
    %64 = vector.load %arg4[%c0_47, %c0_48] : memref<128x128xf32, #tpu.memory_space<vmem>>, vector<128x128xf32>
    %cst_49 = arith.constant dense<0.000000e+00> : vector<8x128xf32>
    %65 = tpu.matmul %63, %64, %cst_49 {dimension_numbers = #tpu.dot_dimension_numbers<[1], [0], [0], [1], [0, 0, 1, 1], [], []>} : vector<8x128xf32>, vector<128x128xf32>, vector<8x128xf32> -> vector<8x128xf32>
    %66 = arith.addf %65, %9 : vector<8x128xf32>
    %c0_50 = arith.constant 0 : index
    %c0_51 = arith.constant 0 : index
    %67 = vector.load %arg5[%c0_50, %c0_51] : memref<128x128xf32, #tpu.memory_space<vmem>>, vector<128x128xf32>
    %cst_52 = arith.constant dense<0.000000e+00> : vector<8x128xf32>
    %68 = tpu.matmul %55, %67, %cst_52 {dimension_numbers = #tpu.dot_dimension_numbers<[1], [0], [0], [1], [0, 0, 1, 1], [], []>} : vector<8x128xf32>, vector<128x128xf32>, vector<8x128xf32> -> vector<8x128xf32>
    %69 = arith.addf %66, %68 : vector<8x128xf32>
    %70 = math.tanh %69 : vector<8x128xf32>
    %c4_i32 = arith.constant 4 : i32
    %c8_i32_53 = arith.constant 8 : i32
    %71 = arith.muli %c4_i32, %c8_i32_53 : i32
    %72 = tpu.assume_multiple %71, 8 : i32
    %73 = arith.index_cast %72 : i32 to index
    %c0_54 = arith.constant 0 : index
    %74 = vector.load %arg10[%73, %c0_54] : memref<64x128xf32, #tpu.memory_space<vmem>>, vector<8x128xf32>
    %c0_55 = arith.constant 0 : index
    %c0_56 = arith.constant 0 : index
    %75 = vector.load %arg2[%c0_55, %c0_56] : memref<128x128xf32, #tpu.memory_space<vmem>>, vector<128x128xf32>
    %cst_57 = arith.constant dense<0.000000e+00> : vector<8x128xf32>
    %76 = tpu.matmul %63, %75, %cst_57 {dimension_numbers = #tpu.dot_dimension_numbers<[1], [0], [0], [1], [0, 0, 1, 1], [], []>} : vector<8x128xf32>, vector<128x128xf32>, vector<8x128xf32> -> vector<8x128xf32>
    %77 = arith.addf %74, %76 : vector<8x128xf32>
    %78 = math.tanh %77 : vector<8x128xf32>
    %c0_58 = arith.constant 0 : index
    %c0_59 = arith.constant 0 : index
    %79 = vector.load %arg4[%c0_58, %c0_59] : memref<128x128xf32, #tpu.memory_space<vmem>>, vector<128x128xf32>
    %cst_60 = arith.constant dense<0.000000e+00> : vector<8x128xf32>
    %80 = tpu.matmul %78, %79, %cst_60 {dimension_numbers = #tpu.dot_dimension_numbers<[1], [0], [0], [1], [0, 0, 1, 1], [], []>} : vector<8x128xf32>, vector<128x128xf32>, vector<8x128xf32> -> vector<8x128xf32>
    %81 = arith.addf %80, %9 : vector<8x128xf32>
    %c0_61 = arith.constant 0 : index
    %c0_62 = arith.constant 0 : index
    %82 = vector.load %arg5[%c0_61, %c0_62] : memref<128x128xf32, #tpu.memory_space<vmem>>, vector<128x128xf32>
    %cst_63 = arith.constant dense<0.000000e+00> : vector<8x128xf32>
    %83 = tpu.matmul %70, %82, %cst_63 {dimension_numbers = #tpu.dot_dimension_numbers<[1], [0], [0], [1], [0, 0, 1, 1], [], []>} : vector<8x128xf32>, vector<128x128xf32>, vector<8x128xf32> -> vector<8x128xf32>
    %84 = arith.addf %81, %83 : vector<8x128xf32>
    %85 = math.tanh %84 : vector<8x128xf32>
    %c5_i32 = arith.constant 5 : i32
    %c8_i32_64 = arith.constant 8 : i32
    %86 = arith.muli %c5_i32, %c8_i32_64 : i32
    %87 = tpu.assume_multiple %86, 8 : i32
    %88 = arith.index_cast %87 : i32 to index
    %c0_65 = arith.constant 0 : index
    %89 = vector.load %arg10[%88, %c0_65] : memref<64x128xf32, #tpu.memory_space<vmem>>, vector<8x128xf32>
    %c0_66 = arith.constant 0 : index
    %c0_67 = arith.constant 0 : index
    %90 = vector.load %arg2[%c0_66, %c0_67] : memref<128x128xf32, #tpu.memory_space<vmem>>, vector<128x128xf32>
    %cst_68 = arith.constant dense<0.000000e+00> : vector<8x128xf32>
    %91 = tpu.matmul %78, %90, %cst_68 {dimension_numbers = #tpu.dot_dimension_numbers<[1], [0], [0], [1], [0, 0, 1, 1], [], []>} : vector<8x128xf32>, vector<128x128xf32>, vector<8x128xf32> -> vector<8x128xf32>
    %92 = arith.addf %89, %91 : vector<8x128xf32>
    %93 = math.tanh %92 : vector<8x128xf32>
    %c0_69 = arith.constant 0 : index
    %c0_70 = arith.constant 0 : index
    %94 = vector.load %arg4[%c0_69, %c0_70] : memref<128x128xf32, #tpu.memory_space<vmem>>, vector<128x128xf32>
    %cst_71 = arith.constant dense<0.000000e+00> : vector<8x128xf32>
    %95 = tpu.matmul %93, %94, %cst_71 {dimension_numbers = #tpu.dot_dimension_numbers<[1], [0], [0], [1], [0, 0, 1, 1], [], []>} : vector<8x128xf32>, vector<128x128xf32>, vector<8x128xf32> -> vector<8x128xf32>
    %96 = arith.addf %95, %9 : vector<8x128xf32>
    %c0_72 = arith.constant 0 : index
    %c0_73 = arith.constant 0 : index
    %97 = vector.load %arg5[%c0_72, %c0_73] : memref<128x128xf32, #tpu.memory_space<vmem>>, vector<128x128xf32>
    %cst_74 = arith.constant dense<0.000000e+00> : vector<8x128xf32>
    %98 = tpu.matmul %85, %97, %cst_74 {dimension_numbers = #tpu.dot_dimension_numbers<[1], [0], [0], [1], [0, 0, 1, 1], [], []>} : vector<8x128xf32>, vector<128x128xf32>, vector<8x128xf32> -> vector<8x128xf32>
    %99 = arith.addf %96, %98 : vector<8x128xf32>
    %100 = math.tanh %99 : vector<8x128xf32>
    %c6_i32 = arith.constant 6 : i32
    %c8_i32_75 = arith.constant 8 : i32
    %101 = arith.muli %c6_i32, %c8_i32_75 : i32
    %102 = tpu.assume_multiple %101, 8 : i32
    %103 = arith.index_cast %102 : i32 to index
    %c0_76 = arith.constant 0 : index
    %104 = vector.load %arg10[%103, %c0_76] : memref<64x128xf32, #tpu.memory_space<vmem>>, vector<8x128xf32>
    %c0_77 = arith.constant 0 : index
    %c0_78 = arith.constant 0 : index
    %105 = vector.load %arg2[%c0_77, %c0_78] : memref<128x128xf32, #tpu.memory_space<vmem>>, vector<128x128xf32>
    %cst_79 = arith.constant dense<0.000000e+00> : vector<8x128xf32>
    %106 = tpu.matmul %93, %105, %cst_79 {dimension_numbers = #tpu.dot_dimension_numbers<[1], [0], [0], [1], [0, 0, 1, 1], [], []>} : vector<8x128xf32>, vector<128x128xf32>, vector<8x128xf32> -> vector<8x128xf32>
    %107 = arith.addf %104, %106 : vector<8x128xf32>
    %108 = math.tanh %107 : vector<8x128xf32>
    %c0_80 = arith.constant 0 : index
    %c0_81 = arith.constant 0 : index
    %109 = vector.load %arg4[%c0_80, %c0_81] : memref<128x128xf32, #tpu.memory_space<vmem>>, vector<128x128xf32>
    %cst_82 = arith.constant dense<0.000000e+00> : vector<8x128xf32>
    %110 = tpu.matmul %108, %109, %cst_82 {dimension_numbers = #tpu.dot_dimension_numbers<[1], [0], [0], [1], [0, 0, 1, 1], [], []>} : vector<8x128xf32>, vector<128x128xf32>, vector<8x128xf32> -> vector<8x128xf32>
    %111 = arith.addf %110, %9 : vector<8x128xf32>
    %c0_83 = arith.constant 0 : index
    %c0_84 = arith.constant 0 : index
    %112 = vector.load %arg5[%c0_83, %c0_84] : memref<128x128xf32, #tpu.memory_space<vmem>>, vector<128x128xf32>
    %cst_85 = arith.constant dense<0.000000e+00> : vector<8x128xf32>
    %113 = tpu.matmul %100, %112, %cst_85 {dimension_numbers = #tpu.dot_dimension_numbers<[1], [0], [0], [1], [0, 0, 1, 1], [], []>} : vector<8x128xf32>, vector<128x128xf32>, vector<8x128xf32> -> vector<8x128xf32>
    %114 = arith.addf %111, %113 : vector<8x128xf32>
    %115 = math.tanh %114 : vector<8x128xf32>
    %c7_i32 = arith.constant 7 : i32
    %c8_i32_86 = arith.constant 8 : i32
    %116 = arith.muli %c7_i32, %c8_i32_86 : i32
    %117 = tpu.assume_multiple %116, 8 : i32
    %118 = arith.index_cast %117 : i32 to index
    %c0_87 = arith.constant 0 : index
    %119 = vector.load %arg10[%118, %c0_87] : memref<64x128xf32, #tpu.memory_space<vmem>>, vector<8x128xf32>
    %c0_88 = arith.constant 0 : index
    %c0_89 = arith.constant 0 : index
    %120 = vector.load %arg2[%c0_88, %c0_89] : memref<128x128xf32, #tpu.memory_space<vmem>>, vector<128x128xf32>
    %cst_90 = arith.constant dense<0.000000e+00> : vector<8x128xf32>
    %121 = tpu.matmul %108, %120, %cst_90 {dimension_numbers = #tpu.dot_dimension_numbers<[1], [0], [0], [1], [0, 0, 1, 1], [], []>} : vector<8x128xf32>, vector<128x128xf32>, vector<8x128xf32> -> vector<8x128xf32>
    %122 = arith.addf %119, %121 : vector<8x128xf32>
    %123 = math.tanh %122 : vector<8x128xf32>
    %c0_91 = arith.constant 0 : index
    %c0_92 = arith.constant 0 : index
    %124 = vector.load %arg4[%c0_91, %c0_92] : memref<128x128xf32, #tpu.memory_space<vmem>>, vector<128x128xf32>
    %cst_93 = arith.constant dense<0.000000e+00> : vector<8x128xf32>
    %125 = tpu.matmul %123, %124, %cst_93 {dimension_numbers = #tpu.dot_dimension_numbers<[1], [0], [0], [1], [0, 0, 1, 1], [], []>} : vector<8x128xf32>, vector<128x128xf32>, vector<8x128xf32> -> vector<8x128xf32>
    %126 = arith.addf %125, %9 : vector<8x128xf32>
    %c0_94 = arith.constant 0 : index
    %c0_95 = arith.constant 0 : index
    %127 = vector.load %arg5[%c0_94, %c0_95] : memref<128x128xf32, #tpu.memory_space<vmem>>, vector<128x128xf32>
    %cst_96 = arith.constant dense<0.000000e+00> : vector<8x128xf32>
    %128 = tpu.matmul %115, %127, %cst_96 {dimension_numbers = #tpu.dot_dimension_numbers<[1], [0], [0], [1], [0, 0, 1, 1], [], []>} : vector<8x128xf32>, vector<128x128xf32>, vector<8x128xf32> -> vector<8x128xf32>
    %129 = arith.addf %126, %128 : vector<8x128xf32>
    %130 = math.tanh %129 : vector<8x128xf32>
    %c8_i32_97 = arith.constant 8 : i32
    %c0_98 = arith.constant 0 : index
    %c0_99 = arith.constant 0 : index
    %131 = vector.load %arg7[%c0_98, %c0_99] : memref<128x128xf32, #tpu.memory_space<vmem>>, vector<128x128xf32>
    %cst_100 = arith.constant dense<0.000000e+00> : vector<8x128xf32>
    %132 = tpu.matmul %130, %131, %cst_100 {dimension_numbers = #tpu.dot_dimension_numbers<[1], [0], [0], [1], [0, 0, 1, 1], [], []>} : vector<8x128xf32>, vector<128x128xf32>, vector<8x128xf32> -> vector<8x128xf32>
    %c0_101 = arith.constant 0 : index
    %c0_102 = arith.constant 0 : index
    %133 = vector.load %arg8[%c0_101, %c0_102] : memref<1x128xf32, #tpu.memory_space<vmem>>, vector<1x128xf32>
    %134 = vector.broadcast %133 : vector<1x128xf32> to vector<8x128xf32>
    %135 = arith.addf %132, %134 : vector<8x128xf32>
    %c0_103 = arith.constant 0 : index
    %c0_104 = arith.constant 0 : index
    %136 = vector.load %arg9[%c0_103, %c0_104] : memref<8x128xf32, #tpu.memory_space<vmem>>, vector<8x128xf32>
    tpu.vector_store %arg9[%c0_103, %c0_104], %135 {strides = array<i32>} : memref<8x128xf32, #tpu.memory_space<vmem>>, vector<8x128xf32>,
    return
  }
}

</mosaic_0001>

<bundles_post_ra>
// kernel: rnn_forward.1
= control target key start
LH: loop header
LB: loop body
LE: loop exit
PB: predicated region body
PF: predicated region fallthrough
CT: control target
= control target key end

     0   :  { %14 = vsyncpa [#allocation4], 0  ;;  %s4899_s0 = inlined_call_operand.vmem [shape: f32[64,128], index: 0, kind: input, shape index: {}]   ;;  %s4900_s1 = inlined_call_operand.hbm [shape: f32[128,128], index: 1, kind: input, shape index: {}]   ;;  %s4901_s2 = inlined_call_operand.hbm [shape: f32[128,128], index: 2, kind: input, shape index: {}]   ;;  %s4902_s3 = inlined_call_operand.vmem [shape: f32[1,128], index: 3, kind: input, shape index: {}]   ;;  %s4903_s4 = inlined_call_operand.hbm [shape: f32[128,128], index: 4, kind: input, shape index: {}]   ;;  %s4904_s5 = inlined_call_operand.hbm [shape: f32[128,128], index: 5, kind: input, shape index: {}]   ;;  %s4905_s6 = inlined_call_operand.vmem [shape: f32[1,128], index: 6, kind: input, shape index: {}]   ;;  %s4906_s7 = inlined_call_operand.hbm [shape: f32[128,128], index: 7, kind: input, shape index: {}]   ;;  %s4907_s8 = inlined_call_operand.vmem [shape: f32[1,128], index: 8, kind: input, shape index: {}]   ;;  %s4908_s9 = inlined_call_operand.vmem [shape: f32[8,128], index: 9, kind: output, shape index: {}]  }
   0x1   :  { %15 = vsyncpa [#allocation6], 0 }
   0x2   :  { %16 = vsyncpa [#allocation9], 0  ;;  %s3695_s30 = smov [#allocation5]   ;;  %s3696_s11 = smov [#allocation8]  }
   0x3   :  { %s36_s10 = sshll.u32 %s3695_s30, 4  ;;  %s62_s12 = sshll.u32 %s3696_s11, 4  ;;  %s37_s10 = int_to_ptr.vmem [resolvable:$true] %s36_s10  ;;  %s63_s12 = int_to_ptr.vmem [resolvable:$true] %s62_s12 }
   0x4   :  { %s3597_s13 = scalar_lea.vmem %s37_s10, 2048  ;;  %p3602_p1 = scmp.lt.s32.totalorder %s37_s10, %s37_s10 }
   0x5   :  { %p3598_p0 = scmp.ne.s32.totalorder %s37_s10, %s3597_s13  ;;  %p3603_p2 = scmp.lt.s32.totalorder %s3597_s13, %s3597_s13 }
   0x7   :  { %p3604_p3 = por %p3603_p2, %p3602_p1 }
   0x9   :  { %p3605_p4 = pnand %p3604_p3, %p3598_p0 }
   0xb   :  { %3608 = shalt.err (!%p3605_p4)
}
   0xc   :  { %s3697_s14 = smov 128   ;;  %s3698_s15 = smov 8  }
   0xd   :  { %42 = dma.hbm_to_vmem [thread:$0]  %s4901_s2, 2048, %s37_s10, [#allocation6], %s3697_s14, %s3697_s14, %s3698_s15  }
   0xe   :  { %s3617_s18 = scalar_lea.vmem %s63_s12, 2048  ;;  %p3622_p6 = scmp.lt.s32.totalorder %s63_s12, %s63_s12 }
   0xf   :  { %p3618_p5 = scmp.ne.s32.totalorder %s63_s12, %s3617_s18  ;;  %p3623_p7 = scmp.lt.s32.totalorder %s3617_s18, %s3617_s18 }
  0x11   :  { %p3624_p8 = por %p3623_p7, %p3622_p6 }
  0x13   :  { %p3625_p9 = pnand %p3624_p8, %p3618_p5 }
  0x15   :  { %3628 = shalt.err (!%p3625_p9)
}
  0x16   :  { %68 = dma.hbm_to_vmem [thread:$0]  %s4904_s5, 2048, %s63_s12, [#allocation9], %s3697_s14, %s3697_s14, %s3698_s15  }
  0x17   :  { %s3699_s21 = smov [#allocation3]   ;;  %s3700_s23 = smov [#allocation7]  }
  0x18   :  { %s24_s22 = sshll.u32 %s3699_s21, 4  ;;  %s50_s24 = sshll.u32 %s3700_s23, 4  ;;  %s25_s22 = int_to_ptr.vmem [resolvable:$true] %s24_s22  ;;  %s51_s24 = int_to_ptr.vmem [resolvable:$true] %s50_s24 }
  0x19   :  { %s3637_s2 = scalar_lea.vmem %s25_s22, 2048  ;;  %p3642_p11 = scmp.lt.s32.totalorder %s25_s22, %s25_s22 }
  0x1a   :  { %p3638_p10 = scmp.ne.s32.totalorder %s25_s22, %s3637_s2  ;;  %p3643_p12 = scmp.lt.s32.totalorder %s3637_s2, %s3637_s2 }
  0x1c   :  { %p3644_p13 = por %p3643_p12, %p3642_p11 }
  0x1e   :  { %p3645_p0 = pnand %p3644_p13, %p3638_p10 }
  0x20   :  { %3648 = shalt.err (!%p3645_p0)
}
  0x21   :  { %30 = dma.hbm_to_vmem [thread:$0]  %s4900_s1, 2048, %s25_s22, [#allocation4], %s3697_s14, %s3697_s14, %s3698_s15  }
  0x22   :  { %s3657_s5 = scalar_lea.vmem %s51_s24, 2048  ;;  %p3662_p2 = scmp.lt.s32.totalorder %s51_s24, %s51_s24 }
  0x23   :  { %p3658_p1 = scmp.ne.s32.totalorder %s51_s24, %s3657_s5  ;;  %p3663_p3 = scmp.lt.s32.totalorder %s3657_s5, %s3657_s5 }
  0x25   :  { %p3664_p4 = por %p3663_p3, %p3662_p2 }
  0x27   :  { %p3665_p5 = pnand %p3664_p4, %p3658_p1 }
  0x29   :  { %3668 = shalt.err (!%p3665_p5)
}
  0x2a   :  { %56 = dma.hbm_to_vmem [thread:$0]  %s4903_s4, 2048, %s51_s24, [#allocation6], %s3697_s14, %s3697_s14, %s3698_s15  }
  0x2b   :  { %s3701_s29 = smov [#allocation10]  }
  0x2c   :  { %s76_s30 = sshll.u32 %s3701_s29, 4  ;;  %s77_s30 = int_to_ptr.vmem [resolvable:$true] %s76_s30 }
  0x2d   :  { %s3677_s10 = scalar_lea.vmem %s77_s30, 2048  ;;  %p3682_p7 = scmp.lt.s32.totalorder %s77_s30, %s77_s30 }
  0x2e   :  { %p3678_p6 = scmp.ne.s32.totalorder %s77_s30, %s3677_s10  ;;  %p3683_p8 = scmp.lt.s32.totalorder %s3677_s10, %s3677_s10 }
  0x30   :  { %p3684_p9 = por %p3683_p8, %p3682_p7 }
  0x32   :  { %p3685_p10 = pnand %p3684_p9, %p3678_p6 }
  0x34   :  { %3688 = shalt.err (!%p3685_p10)
}
  0x35   :  { %82 = dma.hbm_to_vmem [thread:$0]  %s4906_s7, 2048, %s77_s30, [#allocation9], %s3697_s14, %s3697_s14, %s3698_s15  }
  0x36   :  { %3689 = dma.done.wait [#allocation4], 2048  }
  0x37   :  { %3690 = vsyncadd [#allocation4], 4294965248 }
  0x38   :  { %3691 = dma.done.wait [#allocation6], 4096  }
  0x39   :  { %3692 = vsyncadd [#allocation6], 4294963200 }
  0x3a   :  { %3693 = dma.done.wait [#allocation9], 4096  }
  0x3b   :  { %3694 = vsyncadd [#allocation9], 4294963200  ;;  %v3702_v0 = vmov 0.0   ;;  %vm3703_vm0 = vmmov 0   ;;  %v123_v1 = vld [vmem:[#allocation3 + $0x78] sm:$0xff]  ;;  %v122_v2 = vld [vmem:[#allocation3 + $0x70] sm:$0xff] }
  0x3c   :  { %2623 = vmatprep.subr.mxu1 %v3702_v0  ;;  %2655 = vmatprep.mubr.msk.f32.mxu1 %vm3703_vm0, %v3702_v0  ;;  %v3787_v3 = vld [vmem:[#allocation5 + $0x78] sm:$0xff]  ;;  %v3790_v4 = vld [vmem:[#allocation5 + $0x70] sm:$0xff]  ;;  %v121_v5 = vld [vmem:[#allocation3 + $0x68] sm:$0xff] }
  0x3d   :  { %2579 = vmatprep.subr.mxu0 %v123_v1  ;;  %2624 = vmatpush3.msra.mxu1 %v3787_v3  ;;  %v3793_v6 = vld [vmem:[#allocation5 + $0x68] sm:$0xff]  ;;  %v120_v7 = vld [vmem:[#allocation3 + $0x60] sm:$0xff]  ;;  %v119_v9 = vld [vmem:[#allocation3 + $0x58] sm:$0xff] }
  0x3e   :  { %2580 = vmatpush3.msra.mxu0 %v123_v1  ;;  %2625 = vmatprep.subr.mxu1 %v3702_v0  ;;  %v3797_v8 = vld [vmem:[#allocation5 + $0x60] sm:$0xff]  ;;  %v3801_v10 = vld [vmem:[#allocation5 + $0x58] sm:$0xff]  ;;  %v118_v11 = vld [vmem:[#allocation3 + $0x50] sm:$0xff] }
  0x3f   :  { %2581 = vmatprep.subr.mxu0 %v122_v2  ;;  %2626 = vmatpush3.msra.mxu1 %v3790_v4  ;;  %v3805_v12 = vld [vmem:[#allocation5 + $0x50] sm:$0xff]  ;;  %v117_v13 = vld [vmem:[#allocation3 + $0x48] sm:$0xff]  ;;  %v116_v15 = vld [vmem:[#allocation3 + $0x40] sm:$0xff] }
  0x40   :  { %2582 = vmatpush3.msra.mxu0 %v122_v2  ;;  %2627 = vmatprep.subr.mxu1 %v3702_v0  ;;  %v3809_v14 = vld [vmem:[#allocation5 + $0x48] sm:$0xff]  ;;  %v3813_v16 = vld [vmem:[#allocation5 + $0x40] sm:$0xff]  ;;  %v115_v17 = vld [vmem:[#allocation3 + $0x38] sm:$0xff] }
  0x41   :  { %2583 = vmatprep.subr.mxu0 %v121_v5  ;;  %2628 = vmatpush3.msra.mxu1 %v3793_v6  ;;  %v3817_v18 = vld [vmem:[#allocation5 + $0x38] sm:$0xff]  ;;  %v114_v19 = vld [vmem:[#allocation3 + $0x30] sm:$0xff]  ;;  %v113_v21 = vld [vmem:[#allocation3 + $0x28] sm:$0xff] }
  0x42   :  { %2584 = vmatpush3.msra.mxu0 %v121_v5  ;;  %2629 = vmatprep.subr.mxu1 %v3702_v0  ;;  %v3821_v20 = vld [vmem:[#allocation5 + $0x30] sm:$0xff]  ;;  %v3825_v22 = vld [vmem:[#allocation5 + $0x28] sm:$0xff]  ;;  %v112_v23 = vld [vmem:[#allocation3 + $0x20] sm:$0xff] }
  0x43   :  { %2585 = vmatprep.subr.mxu0 %v120_v7  ;;  %2630 = vmatpush3.msra.mxu1 %v3797_v8  ;;  %v3829_v24 = vld [vmem:[#allocation5 + $0x20] sm:$0xff]  ;;  %v111_v25 = vld [vmem:[#allocation3 + $0x18] sm:$0xff]  ;;  %v110_v27 = vld [vmem:[#allocation3 + $0x10] sm:$0xff] }
  0x44   :  { %2586 = vmatpush3.msra.mxu0 %v120_v7  ;;  %2631 = vmatprep.subr.mxu1 %v3702_v0  ;;  %v3833_v26 = vld [vmem:[#allocation5 + $0x18] sm:$0xff]  ;;  %v3837_v28 = vld [vmem:[#allocation5 + $0x10] sm:$0xff]  ;;  %v109_v29 = vld [vmem:[#allocation3 + $0x8] sm:$0xff] }
  0x45   :  { %2587 = vmatprep.subr.mxu0 %v119_v9  ;;  %2632 = vmatpush3.msra.mxu1 %v3801_v10  ;;  %v100_v30 = vld [vmem:[%s4899_s0] sm:$0xff]  ;;  %v3845_v31 = vld [vmem:[#allocation5 + $0x8] sm:$0xff]  ;;  %v3856_v35 = vld [vmem:[#allocation7 + $0x78] sm:$0xff] }
  0x46   :  { %2588 = vmatpush3.msra.mxu0 %v119_v9  ;;  %2633 = vmatprep.subr.mxu1 %v3702_v0  ;;  %v108_v32 = vld [vmem:[#allocation3] sm:$0xff]  ;;  %v101_v34 = vld [vmem:[%s4899_s0 + $0x8] sm:$0xff]  ;;  %v3858_v36 = vld [vmem:[#allocation8 + $0x78] sm:$0xff] }
  0x47   :  { %2589 = vmatprep.subr.mxu0 %v118_v11  ;;  %2634 = vmatpush3.msra.mxu1 %v3805_v12  ;;  %v3848_v33 = vld [vmem:[#allocation5] sm:$0xff]  ;;  %v3862_v37 = vld [vmem:[#allocation7 + $0x70] sm:$0xff]  ;;  %v3870_v39 = vld [vmem:[#allocation7 + $0x68] sm:$0xff] }
  0x48   :  { %2590 = vmatpush3.msra.mxu0 %v118_v11  ;;  %2635 = vmatprep.subr.mxu1 %v3702_v0  ;;  %v3865_v38 = vld [vmem:[#allocation8 + $0x70] sm:$0xff]  ;;  %v3873_v40 = vld [vmem:[#allocation8 + $0x68] sm:$0xff]  ;;  %v3878_v41 = vld [vmem:[#allocation7 + $0x60] sm:$0xff] }
  0x49   :  { %2591 = vmatprep.subr.mxu0 %v117_v13  ;;  %2636 = vmatpush3.msra.mxu1 %v3809_v14  ;;  %v3881_v42 = vld [vmem:[#allocation8 + $0x60] sm:$0xff]  ;;  %v3886_v43 = vld [vmem:[#allocation7 + $0x58] sm:$0xff]  ;;  %v3892_v44 = vld [vmem:[#allocation7 + $0x50] sm:$0xff] }
  0x4a   :  { %2592 = vmatpush3.msra.mxu0 %v117_v13  ;;  %2637 = vmatprep.subr.mxu1 %v3702_v0  ;;  %v3901_v45 = vld [vmem:[#allocation8 + $0x58] sm:$0xff]  ;;  %v3904_v46 = vld [vmem:[#allocation7 + $0x48] sm:$0xff]  ;;  %v3908_v47 = vld [vmem:[#allocation8 + $0x50] sm:$0xff] }
  0x4b   :  { %2593 = vmatprep.subr.mxu0 %v116_v15  ;;  %2638 = vmatpush3.msra.mxu1 %v3813_v16  ;;  %v3912_v48 = vld [vmem:[#allocation7 + $0x40] sm:$0xff]  ;;  %v3916_v49 = vld [vmem:[#allocation8 + $0x48] sm:$0xff]  ;;  %v3920_v50 = vld [vmem:[#allocation7 + $0x38] sm:$0xff] }
  0x4c   :  { %2594 = vmatpush3.msra.mxu0 %v116_v15  ;;  %2639 = vmatprep.subr.mxu1 %v3702_v0  ;;  %v102_v51 = vld [vmem:[%s4899_s0 + $0x10] sm:$0xff]  ;;  %v3927_v52 = vld [vmem:[#allocation8 + $0x40] sm:$0xff]  ;;  %v103_v53 = vld [vmem:[%s4899_s0 + $0x18] sm:$0xff] }
  0x4d   :  { %2595 = vmatprep.subr.mxu0 %v115_v17  ;;  %2640 = vmatpush3.msra.mxu1 %v3817_v18  ;;  %v3933_v54 = vld [vmem:[#allocation7 + $0x30] sm:$0xff]  ;;  %v3936_v55 = vld [vmem:[#allocation8 + $0x38] sm:$0xff]  ;;  %v3938_v56 = vld [vmem:[#allocation7 + $0x28] sm:$0xff] }
  0x4e   :  { %2596 = vmatpush3.msra.mxu0 %v115_v17  ;;  %2641 = vmatprep.subr.mxu1 %v3702_v0  ;;  %v104_v57 = vld [vmem:[%s4899_s0 + $0x20] sm:$0xff]  ;;  %v3947_v58 = vld [vmem:[#allocation8 + $0x30] sm:$0xff]  ;;  %v105_v59 = vld [vmem:[%s4899_s0 + $0x28] sm:$0xff] }
  0x4f   :  { %2597 = vmatprep.subr.mxu0 %v114_v19  ;;  %2642 = vmatpush3.msra.mxu1 %v3821_v20  ;;  %v3954_v60 = vld [vmem:[#allocation7 + $0x20] sm:$0xff]  ;;  %v3957_v61 = vld [vmem:[#allocation8 + $0x28] sm:$0xff]  ;;  %v3960_v62 = vld [vmem:[#allocation7 + $0x18] sm:$0xff] }
  0x50   :  { %2598 = vmatpush3.msra.mxu0 %v114_v19  ;;  %2643 = vmatprep.subr.mxu1 %v3702_v0  ;;  %v106_v63 = vld [vmem:[%s4899_s0 + $0x30] sm:$0xff]  ;;  %v3969_v1 = vld [vmem:[#allocation8 + $0x20] sm:$0xff]  ;;  %v107_v2 = vld [vmem:[%s4899_s0 + $0x38] sm:$0xff] }
  0x51   :  { %2599 = vmatprep.subr.mxu0 %v113_v21  ;;  %2644 = vmatpush3.msra.mxu1 %v3825_v22  ;;  %v3976_v5 = vld [vmem:[#allocation7 + $0x10] sm:$0xff]  ;;  %v3979_v7 = vld [vmem:[#allocation8 + $0x18] sm:$0xff]  ;;  %v3982_v9 = vld [vmem:[#allocation7 + $0x8] sm:$0xff] }
  0x52   :  { %2600 = vmatpush3.msra.mxu0 %v113_v21  ;;  %2645 = vmatprep.subr.mxu1 %v3702_v0  ;;  %v3986_v11 = vld [vmem:[#allocation8 + $0x10] sm:$0xff]  ;;  %v3990_v13 = vld [vmem:[#allocation7] sm:$0xff]  ;;  %v3994_v15 = vld [vmem:[#allocation8 + $0x8] sm:$0xff] }
  0x53   :  { %2601 = vmatprep.subr.mxu0 %v112_v23  ;;  %2646 = vmatpush3.msra.mxu1 %v3829_v24  ;;  %v4000_v17 = vld [vmem:[#allocation8] sm:$0xff] }
  0x54   :  { %2602 = vmatpush3.msra.mxu0 %v112_v23  ;;  %2647 = vmatprep.subr.mxu1 %v3702_v0  ;;  %v4049_v23 = vld [vmem:[%s4902_s3] ss:$0 sm:$0xff] }
  0x55   :  { %2603 = vmatprep.subr.mxu0 %v111_v25  ;;  %2648 = vmatpush3.msra.mxu1 %v3833_v26 }
  0x56   :  { %2604 = vmatpush3.msra.mxu0 %v111_v25  ;;  %2649 = vmatprep.subr.mxu1 %v3702_v0 }
  0x57   :  { %2605 = vmatprep.subr.mxu0 %v110_v27  ;;  %2650 = vmatpush3.msra.mxu1 %v3837_v28 }
  0x58   :  { %2606 = vmatpush3.msra.mxu0 %v110_v27  ;;  %2651 = vmatprep.subr.mxu1 %v3702_v0 }
  0x59   :  { %2607 = vmatprep.subr.mxu0 %v109_v29  ;;  %2611 = vmatprep.mubr.f32.mxu0 %v100_v30 }
  0x5a   :  { %2608 = vmatpush3.msra.mxu0 %v109_v29  ;;  %2652 = vmatpush3.msra.mxu1 %v3845_v31 }
  0x5b   :  { %2609 = vmatprep.subr.mxu0 %v108_v32  ;;  %2653 = vmatprep.subr.mxu1 %v3702_v0 }
  0x5c   :  { %2610 = vmatpush3.msra.mxu0 %v108_v32  ;;  %2654 = vmatpush3.msra.mxu1 %v3848_v33 }
  0x5d   :  { %2612 = vmatmul.mubr.f32.vlgmr.msra.gmra.mxu0 %v101_v34  ;;  %2656 = vmatmul.mubr.f32.vlgmr.msra.gmra.mxu1 %v3702_v0 }
  0x5e   :  { %2658 = vmatprep.subr.mxu0 %v3702_v0  ;;  %2693 = vmatprep.subr.mxu1 %v3702_v0 }
  0x5f   :  { %2659 = vmatpush3.msra.mxu0 %v3856_v35  ;;  %2694 = vmatpush3.msra.mxu1 %v3858_v36 }
  0x60   :  { %2660 = vmatprep.subr.mxu0 %v3702_v0  ;;  %2695 = vmatprep.subr.mxu1 %v3702_v0 }
  0x61   :  { %2661 = vmatpush3.msra.mxu0 %v3862_v37  ;;  %2696 = vmatpush3.msra.mxu1 %v3865_v38 }
  0x62   :  { %2662 = vmatprep.subr.mxu0 %v3702_v0  ;;  %2697 = vmatprep.subr.mxu1 %v3702_v0 }
  0x63   :  { %2663 = vmatpush3.msra.mxu0 %v3870_v39  ;;  %2698 = vmatpush3.msra.mxu1 %v3873_v40 }
  0x64   :  { %2664 = vmatprep.subr.mxu0 %v3702_v0  ;;  %2699 = vmatprep.subr.mxu1 %v3702_v0 }
  0x65   :  { %2665 = vmatpush3.msra.mxu0 %v3878_v41  ;;  %2700 = vmatpush3.msra.mxu1 %v3881_v42 }
  0x66   :  { %2666 = vmatprep.subr.mxu0 %v3702_v0  ;;  %2701 = vmatprep.subr.mxu1 %v3702_v0 }
  0x67   :  { %2667 = vmatpush3.msra.mxu0 %v3886_v43  ;;  %2725 = vmatprep.mubr.msk.f32.mxu1 %vm3703_vm0, %v3702_v0 }
  0x68   :  { %2668 = vmatprep.subr.mxu0 %v3702_v0  ;;  %2702 = vmatpush3.msra.mxu1 %v3901_v45 }
  0x69   :  { %2669 = vmatpush3.msra.mxu0 %v3892_v44  ;;  %2703 = vmatprep.subr.mxu1 %v3702_v0 }
  0x6a   :  { %2670 = vmatprep.subr.mxu0 %v3702_v0  ;;  %2704 = vmatpush3.msra.mxu1 %v3908_v47 }
  0x6b   :  { %2671 = vmatpush3.msra.mxu0 %v3904_v46  ;;  %2705 = vmatprep.subr.mxu1 %v3702_v0 }
  0x6c   :  { %2672 = vmatprep.subr.mxu0 %v3702_v0  ;;  %2706 = vmatpush3.msra.mxu1 %v3916_v49 }
  0x6d   :  { %2673 = vmatpush3.msra.mxu0 %v3912_v48  ;;  %2707 = vmatprep.subr.mxu1 %v3702_v0 }
  0x6e   :  { %2674 = vmatprep.subr.mxu0 %v3702_v0  ;;  %2614 = vmatprep.mubr.f32.mxu0 %v102_v51 }
  0x6f   :  { %2675 = vmatpush3.msra.mxu0 %v3920_v50  ;;  %2708 = vmatpush3.msra.mxu1 %v3927_v52 }
  0x70   :  { %2676 = vmatprep.subr.mxu0 %v3702_v0  ;;  %2615 = vmatmul.mubr.f32.gmra.mxu0 %v103_v53 }
  0x71   :  { %2677 = vmatpush3.msra.mxu0 %v3933_v54  ;;  %2709 = vmatprep.subr.mxu1 %v3702_v0 }
  0x72   :  { %2678 = vmatprep.subr.mxu0 %v3702_v0  ;;  %2710 = vmatpush3.msra.mxu1 %v3936_v55 }
  0x73   :  { %2679 = vmatpush3.msra.mxu0 %v3938_v56  ;;  %2711 = vmatprep.subr.mxu1 %v3702_v0 }
  0x74   :  { %2617 = vmatprep.mubr.f32.mxu0 %v104_v57  ;;  %2680 = vmatprep.subr.mxu0 %v3702_v0 }
  0x75   :  { %2712 = vmatpush3.msra.mxu1 %v3947_v58  ;;  %2618 = vmatmul.mubr.f32.gmra.mxu0 %v105_v59 }
  0x76   :  { %2681 = vmatpush3.msra.mxu0 %v3954_v60  ;;  %2713 = vmatprep.subr.mxu1 %v3702_v0 }
  0x77   :  { %2682 = vmatprep.subr.mxu0 %v3702_v0  ;;  %2714 = vmatpush3.msra.mxu1 %v3957_v61 }
  0x78   :  { %2683 = vmatpush3.msra.mxu0 %v3960_v62  ;;  %2715 = vmatprep.subr.mxu1 %v3702_v0 }
  0x79   :  { %2620 = vmatprep.mubr.f32.mxu0 %v106_v63  ;;  %2684 = vmatprep.subr.mxu0 %v3702_v0 }
  0x7a   :  { %2716 = vmatpush3.msra.mxu1 %v3969_v1  ;;  %2621 = vmatmul.mubr.f32.gmra.mxu0 %v107_v2 }
  0x7b   :  { %2685 = vmatpush3.msra.mxu0 %v3976_v5  ;;  %2717 = vmatprep.subr.mxu1 %v3702_v0 }
  0x7c   :  { %2686 = vmatprep.subr.mxu0 %v3702_v0  ;;  %2718 = vmatpush3.msra.mxu1 %v3979_v7 }
  0x7d   :  { %2687 = vmatpush3.msra.mxu0 %v3982_v9  ;;  %2719 = vmatprep.subr.mxu1 %v3702_v0 }
  0x7e   :  { %2688 = vmatprep.subr.mxu0 %v3702_v0  ;;  %2720 = vmatpush3.msra.mxu1 %v3986_v11 }
  0x7f   :  { %2689 = vmatpush3.msra.mxu0 %v3990_v13  ;;  %2721 = vmatprep.subr.mxu1 %v3702_v0 }
  0x80   :  { %2690 = vmatprep.mubr.msk.f32.mxu0 %vm3703_vm0, %v3702_v0  ;;  %2722 = vmatpush3.msra.mxu1 %v3994_v15 }
  0x81   :  { %2728 = vmatprep.subr.mxu0 %v3702_v0  ;;  %2723 = vmatprep.subr.mxu1 %v3702_v0 }
  0x82   :  { %2724 = vmatpush3.msra.mxu1 %v4000_v17 }
  0x83   :  { %2726 = vmatmul.mubr.f32.vlgmr.msra.gmra.mxu1 %v3702_v0  ;;  %2763 = vmatprep.subr.mxu1 %v3702_v0 }
  0x84   :  { %2764 = vmatpush3.msra.mxu1 %v3856_v35  ;;  %2795 = vmatprep.mubr.msk.f32.mxu1 %vm3703_vm0, %v3702_v0 }
  0x85   :  { %2765 = vmatprep.subr.mxu1 %v3702_v0 }
  0x86   :  { %2766 = vmatpush3.msra.mxu1 %v3862_v37 }
  0x87   :  { %2767 = vmatprep.subr.mxu1 %v3702_v0 }
  0x88   :  { %2768 = vmatpush3.msra.mxu1 %v3870_v39 }
  0x89   :  { %2769 = vmatprep.subr.mxu1 %v3702_v0 }
  0x8a   :  { %2770 = vmatpush3.msra.mxu1 %v3878_v41 }
  0x8b   :  { %2771 = vmatprep.subr.mxu1 %v3702_v0 }
  0x8c   :  { %2772 = vmatpush3.msra.mxu1 %v3886_v43 }
  0x8d   :  { %2773 = vmatprep.subr.mxu1 %v3702_v0 }
  0x8e   :  { %2774 = vmatpush3.msra.mxu1 %v3892_v44 }
  0x8f   :  { %2775 = vmatprep.subr.mxu1 %v3702_v0 }
  0x90   :  { %2776 = vmatpush3.msra.mxu1 %v3904_v46 }
  0x91   :  { %2777 = vmatprep.subr.mxu1 %v3702_v0 }
  0x92   :  { %2778 = vmatpush3.msra.mxu1 %v3912_v48 }
  0x93   :  { %2779 = vmatprep.subr.mxu1 %v3702_v0 }
  0x94   :  { %2780 = vmatpush3.msra.mxu1 %v3920_v50 }
  0x95   :  { %2781 = vmatprep.subr.mxu1 %v3702_v0 }
  0x96   :  { %2782 = vmatpush3.msra.mxu1 %v3933_v54 }
  0x97   :  { %2783 = vmatprep.subr.mxu1 %v3702_v0 }
  0x98   :  { %2784 = vmatpush3.msra.mxu1 %v3938_v56 }
  0x99   :  { %2785 = vmatprep.subr.mxu1 %v3702_v0 }
  0x9a   :  { %2786 = vmatpush3.msra.mxu1 %v3954_v60 }
  0x9b   :  { %2787 = vmatprep.subr.mxu1 %v3702_v0 }
  0x9c   :  { %2788 = vmatpush3.msra.mxu1 %v3960_v62 }
  0x9d   :  { %2789 = vmatprep.subr.mxu1 %v3702_v0 }
  0x9e   :  { %2790 = vmatpush3.msra.mxu1 %v3976_v5 }
  0x9f   :  { %2791 = vmatprep.subr.mxu1 %v3702_v0 }
  0xa0   :  { %2792 = vmatpush3.msra.mxu1 %v3982_v9 }
  0xa1   :  { %2793 = vmatprep.subr.mxu1 %v3702_v0 }
  0xa2   :  { %2794 = vmatpush3.msra.mxu1 %v3990_v13 }
  0xa3   :  { %2833 = vmatprep.subr.mxu1 %v3702_v0 }
 0x11d   :  { %v4044_v19 = vpop.f32.mrf.mxu0  ;;  %v334_v21 = vpop.f32.mrf.mxu1 }
 0x11f   :  { %v197_v25 = vpop.f32.mrf.mxu0  ;;  %v2657_v27 = vpop.f32.mrf.mxu1 }
 0x120   :  { %v198_v29 = vadd.f32 %v4049_v23, %v197_v25  ;;  %v4135_v25 = vld [vmem:[%s4905_s6] ss:$0 sm:$0xff] }
 0x122   :  { %v338_v30 = vadd.f32 %v334_v21, %v198_v29 }
 0x124   :  { %3507 = vtanh.f32 %v338_v30 }
 0x130   :  { %v4120_v53 = vpop.f32.mrf.mxu0 }
 0x131   :  { %v3508_v32 = vpop.eup %3507 }
 0x132   :  { %2691 = vmatmul.mubr.f32.vlgmr.msra.gmra.mxu0 %v3508_v32  ;;  %v4122_v57 = vpop.f32.mrf.mxu0 }
 0x133   :  { %2729 = vmatpush3.msra.mxu0 %v3787_v3  ;;  %2760 = vmatprep.mubr.msk.f32.mxu0 %vm3703_vm0, %v3702_v0 }
 0x134   :  { %2730 = vmatprep.subr.mxu0 %v3702_v0 }
 0x135   :  { %2731 = vmatpush3.msra.mxu0 %v3790_v4  ;;  %v4124_v59 = vpop.f32.mrf.mxu0 }
 0x136   :  { %2732 = vmatprep.subr.mxu0 %v3702_v0 }
 0x137   :  { %2733 = vmatpush3.msra.mxu0 %v3793_v6  ;;  %v4126_v63 = vpop.f32.mrf.mxu0 }
 0x138   :  { %2734 = vmatprep.subr.mxu0 %v3702_v0 }
 0x139   :  { %2735 = vmatpush3.msra.mxu0 %v3797_v8 }
 0x13a   :  { %2736 = vmatprep.subr.mxu0 %v3702_v0  ;;  %v4128_v2 = vpop.f32.mrf.mxu0 }
 0x13b   :  { %2737 = vmatpush3.msra.mxu0 %v3801_v10 }
 0x13c   :  { %2738 = vmatprep.subr.mxu0 %v3702_v0  ;;  %v4130_v21 = vpop.f32.mrf.mxu0 }
 0x13d   :  { %2739 = vmatpush3.msra.mxu0 %v3805_v12 }
 0x13e   :  { %2740 = vmatprep.subr.mxu0 %v3702_v0 }
 0x13f   :  { %2741 = vmatpush3.msra.mxu0 %v3809_v14 }
 0x140   :  { %2742 = vmatprep.subr.mxu0 %v3702_v0 }
 0x141   :  { %2743 = vmatpush3.msra.mxu0 %v3813_v16 }
 0x142   :  { %2744 = vmatprep.subr.mxu0 %v3702_v0 }
 0x143   :  { %2745 = vmatpush3.msra.mxu0 %v3817_v18  ;;  %v508_v34 = vpop.f32.mrf.mxu1 }
 0x144   :  { %2746 = vmatprep.subr.mxu0 %v3702_v0 }
 0x145   :  { %2747 = vmatpush3.msra.mxu0 %v3821_v20  ;;  %v2727_v51 = vpop.f32.mrf.mxu1 }
 0x146   :  { %2748 = vmatprep.subr.mxu0 %v3702_v0 }
 0x147   :  { %2749 = vmatpush3.msra.mxu0 %v3825_v22 }
 0x148   :  { %2750 = vmatprep.subr.mxu0 %v3702_v0 }
 0x149   :  { %2751 = vmatpush3.msra.mxu0 %v3829_v24 }
 0x14a   :  { %2752 = vmatprep.subr.mxu0 %v3702_v0 }
 0x14b   :  { %2753 = vmatpush3.msra.mxu0 %v3833_v26 }
 0x14c   :  { %2754 = vmatprep.subr.mxu0 %v3702_v0 }
 0x14d   :  { %2755 = vmatpush3.msra.mxu0 %v3837_v28 }
 0x14e   :  { %2756 = vmatprep.subr.mxu0 %v3702_v0 }
 0x14f   :  { %2757 = vmatpush3.msra.mxu0 %v3845_v31 }
 0x150   :  { %2758 = vmatprep.subr.mxu0 %v3702_v0 }
 0x151   :  { %2759 = vmatpush3.msra.mxu0 %v3848_v33 }
 0x152   :  { %2761 = vmatmul.mubr.f32.vlgmr.msra.gmra.mxu0 %v3508_v32  ;;  %2798 = vmatprep.subr.mxu0 %v3702_v0 }
 0x153   :  { %2799 = vmatpush3.msra.mxu0 %v3858_v36  ;;  %2830 = vmatprep.mubr.msk.f32.mxu0 %vm3703_vm0, %v3702_v0 }
 0x154   :  { %2800 = vmatprep.subr.mxu0 %v3702_v0 }
 0x155   :  { %2801 = vmatpush3.msra.mxu0 %v3865_v38 }
 0x156   :  { %2802 = vmatprep.subr.mxu0 %v3702_v0 }
 0x157   :  { %2803 = vmatpush3.msra.mxu0 %v3873_v40 }
 0x158   :  { %2804 = vmatprep.subr.mxu0 %v3702_v0 }
 0x159   :  { %2805 = vmatpush3.msra.mxu0 %v3881_v42 }
 0x15a   :  { %2806 = vmatprep.subr.mxu0 %v3702_v0 }
 0x15b   :  { %2807 = vmatpush3.msra.mxu0 %v3901_v45 }
 0x15c   :  { %2808 = vmatprep.subr.mxu0 %v3702_v0 }
 0x15d   :  { %2809 = vmatpush3.msra.mxu0 %v3908_v47 }
 0x15e   :  { %2810 = vmatprep.subr.mxu0 %v3702_v0 }
 0x15f   :  { %2811 = vmatpush3.msra.mxu0 %v3916_v49 }
 0x160   :  { %2812 = vmatprep.subr.mxu0 %v3702_v0 }
 0x161   :  { %2813 = vmatpush3.msra.mxu0 %v3927_v52 }
 0x162   :  { %2814 = vmatprep.subr.mxu0 %v3702_v0 }
 0x163   :  { %2815 = vmatpush3.msra.mxu0 %v3936_v55 }
 0x164   :  { %2816 = vmatprep.subr.mxu0 %v3702_v0 }
 0x165   :  { %2817 = vmatpush3.msra.mxu0 %v3947_v58 }
 0x166   :  { %2818 = vmatprep.subr.mxu0 %v3702_v0 }
 0x167   :  { %2819 = vmatpush3.msra.mxu0 %v3957_v61 }
 0x168   :  { %2820 = vmatprep.subr.mxu0 %v3702_v0 }
 0x169   :  { %2821 = vmatpush3.msra.mxu0 %v3969_v1 }
 0x16a   :  { %2822 = vmatprep.subr.mxu0 %v3702_v0 }
 0x16b   :  { %2823 = vmatpush3.msra.mxu0 %v3979_v7 }
 0x16c   :  { %2824 = vmatprep.subr.mxu0 %v3702_v0 }
 0x16d   :  { %2825 = vmatpush3.msra.mxu0 %v3986_v11 }
 0x16e   :  { %2826 = vmatprep.subr.mxu0 %v3702_v0 }
 0x16f   :  { %2827 = vmatpush3.msra.mxu0 %v3994_v15 }
 0x170   :  { %2828 = vmatprep.subr.mxu0 %v3702_v0 }
 0x171   :  { %2829 = vmatpush3.msra.mxu0 %v4000_v17 }
 0x172   :  { %2868 = vmatprep.subr.mxu0 %v3702_v0 }
 0x1f2   :  { %v422_v27 = vpop.f32.mrf.mxu0 }
 0x1f3   :  { %v423_v29 = vadd.f32 %v4135_v25, %v422_v27 }
 0x1f4   :  { %v2692_v30 = vpop.f32.mrf.mxu0 }
 0x1f5   :  { %v512_v32 = vadd.f32 %v508_v34, %v423_v29  ;;  %v203_v34 = vadd.f32 %v4044_v19, %v4049_v23 }
 0x1f7   :  { %3509 = vtanh.f32 %v512_v32 }
 0x204   :  { %v3510_v51 = vpop.eup %3509 }
 0x205   :  { %2831 = vmatmul.mubr.f32.vlgmr.msra.gmra.mxu0 %v3510_v51 }
 0x206   :  { %2869 = vmatpush3.msra.mxu0 %v3856_v35  ;;  %2900 = vmatprep.mubr.msk.f32.mxu0 %vm3703_vm0, %v3702_v0 }
 0x207   :  { %2870 = vmatprep.subr.mxu0 %v3702_v0 }
 0x208   :  { %2871 = vmatpush3.msra.mxu0 %v3862_v37 }
 0x209   :  { %2872 = vmatprep.subr.mxu0 %v3702_v0 }
 0x20a   :  { %2873 = vmatpush3.msra.mxu0 %v3870_v39 }
 0x20b   :  { %2874 = vmatprep.subr.mxu0 %v3702_v0 }
 0x20c   :  { %2875 = vmatpush3.msra.mxu0 %v3878_v41 }
 0x20d   :  { %2876 = vmatprep.subr.mxu0 %v3702_v0 }
 0x20e   :  { %2877 = vmatpush3.msra.mxu0 %v3886_v43 }
 0x20f   :  { %2878 = vmatprep.subr.mxu0 %v3702_v0 }
 0x210   :  { %2879 = vmatpush3.msra.mxu0 %v3892_v44 }
 0x211   :  { %2880 = vmatprep.subr.mxu0 %v3702_v0 }
 0x212   :  { %v582_v27 = vpop.f32.mrf.mxu0  ;;  %2881 = vmatpush3.msra.mxu0 %v3904_v46 }
 0x213   :  { %v586_v29 = vadd.f32 %v582_v27, %v203_v34  ;;  %2882 = vmatprep.subr.mxu0 %v3702_v0 }
 0x214   :  { %v2762_v30 = vpop.f32.mrf.mxu0  ;;  %2883 = vmatpush3.msra.mxu0 %v3912_v48 }
 0x215   :  { %3511 = vtanh.f32 %v586_v29  ;;  %2884 = vmatprep.subr.mxu0 %v3702_v0 }
 0x216   :  { %2885 = vmatpush3.msra.mxu0 %v3920_v50 }
 0x217   :  { %2886 = vmatprep.subr.mxu0 %v3702_v0 }
 0x218   :  { %2887 = vmatpush3.msra.mxu0 %v3933_v54 }
 0x219   :  { %2888 = vmatprep.subr.mxu0 %v3702_v0 }
 0x21a   :  { %2889 = vmatpush3.msra.mxu0 %v3938_v56 }
 0x21b   :  { %2890 = vmatprep.subr.mxu0 %v3702_v0 }
 0x21c   :  { %2891 = vmatpush3.msra.mxu0 %v3954_v60 }
 0x21d   :  { %2892 = vmatprep.subr.mxu0 %v3702_v0 }
 0x21e   :  { %2893 = vmatpush3.msra.mxu0 %v3960_v62 }
 0x21f   :  { %2894 = vmatprep.subr.mxu0 %v3702_v0 }
 0x220   :  { %2895 = vmatpush3.msra.mxu0 %v3976_v5 }
 0x221   :  { %2896 = vmatprep.subr.mxu0 %v3702_v0 }
 0x222   :  { %v3512_v19 = vpop.eup %3511  ;;  %2897 = vmatpush3.msra.mxu0 %v3982_v9 }
 0x223   :  { %2796 = vmatmul.mubr.f32.vlgmr.msra.gmra.mxu1 %v3512_v19  ;;  %2898 = vmatprep.subr.mxu0 %v3702_v0 }
 0x224   :  { %2834 = vmatpush3.msra.mxu1 %v3787_v3  ;;  %2865 = vmatprep.mubr.msk.f32.mxu1 %vm3703_vm0, %v3702_v0 }
 0x225   :  { %2835 = vmatprep.subr.mxu1 %v3702_v0  ;;  %2899 = vmatpush3.msra.mxu0 %v3990_v13 }
 0x226   :  { %2836 = vmatpush3.msra.mxu1 %v3790_v4  ;;  %2938 = vmatprep.subr.mxu0 %v3702_v0 }
 0x227   :  { %2837 = vmatprep.subr.mxu1 %v3702_v0 }
 0x228   :  { %2838 = vmatpush3.msra.mxu1 %v3793_v6 }
 0x229   :  { %2839 = vmatprep.subr.mxu1 %v3702_v0 }
 0x22a   :  { %2840 = vmatpush3.msra.mxu1 %v3797_v8 }
 0x22b   :  { %2841 = vmatprep.subr.mxu1 %v3702_v0 }
 0x22c   :  { %2842 = vmatpush3.msra.mxu1 %v3801_v10 }
 0x22d   :  { %2843 = vmatprep.subr.mxu1 %v3702_v0 }
 0x22e   :  { %2844 = vmatpush3.msra.mxu1 %v3805_v12 }
 0x22f   :  { %2845 = vmatprep.subr.mxu1 %v3702_v0 }
 0x230   :  { %2846 = vmatpush3.msra.mxu1 %v3809_v14 }
 0x231   :  { %2847 = vmatprep.subr.mxu1 %v3702_v0 }
 0x232   :  { %2848 = vmatpush3.msra.mxu1 %v3813_v16 }
 0x233   :  { %2849 = vmatprep.subr.mxu1 %v3702_v0 }
 0x234   :  { %2850 = vmatpush3.msra.mxu1 %v3817_v18 }
 0x235   :  { %2851 = vmatprep.subr.mxu1 %v3702_v0 }
 0x236   :  { %2852 = vmatpush3.msra.mxu1 %v3821_v20 }
 0x237   :  { %2853 = vmatprep.subr.mxu1 %v3702_v0 }
 0x238   :  { %2854 = vmatpush3.msra.mxu1 %v3825_v22 }
 0x239   :  { %2855 = vmatprep.subr.mxu1 %v3702_v0 }
 0x23a   :  { %2856 = vmatpush3.msra.mxu1 %v3829_v24 }
 0x23b   :  { %2857 = vmatprep.subr.mxu1 %v3702_v0 }
 0x23c   :  { %2858 = vmatpush3.msra.mxu1 %v3833_v26 }
 0x23d   :  { %2859 = vmatprep.subr.mxu1 %v3702_v0 }
 0x23e   :  { %2860 = vmatpush3.msra.mxu1 %v3837_v28 }
 0x23f   :  { %2861 = vmatprep.subr.mxu1 %v3702_v0 }
 0x240   :  { %2862 = vmatpush3.msra.mxu1 %v3845_v31 }
 0x241   :  { %2863 = vmatprep.subr.mxu1 %v3702_v0 }
 0x242   :  { %2864 = vmatpush3.msra.mxu1 %v3848_v33 }
 0x243   :  { %2866 = vmatmul.mubr.f32.vlgmr.msra.gmra.mxu1 %v3512_v19  ;;  %2903 = vmatprep.subr.mxu1 %v3702_v0 }
 0x244   :  { %2904 = vmatpush3.msra.mxu1 %v3858_v36  ;;  %2935 = vmatprep.mubr.msk.f32.mxu1 %vm3703_vm0, %v3702_v0 }
 0x245   :  { %2905 = vmatprep.subr.mxu1 %v3702_v0 }
 0x246   :  { %2906 = vmatpush3.msra.mxu1 %v3865_v38 }
 0x247   :  { %2907 = vmatprep.subr.mxu1 %v3702_v0 }
 0x248   :  { %2908 = vmatpush3.msra.mxu1 %v3873_v40 }
 0x249   :  { %2909 = vmatprep.subr.mxu1 %v3702_v0 }
 0x24a   :  { %2910 = vmatpush3.msra.mxu1 %v3881_v42 }
 0x24b   :  { %2911 = vmatprep.subr.mxu1 %v3702_v0 }
 0x24c   :  { %2912 = vmatpush3.msra.mxu1 %v3901_v45 }
 0x24d   :  { %2913 = vmatprep.subr.mxu1 %v3702_v0 }
 0x24e   :  { %2914 = vmatpush3.msra.mxu1 %v3908_v47 }
 0x24f   :  { %2915 = vmatprep.subr.mxu1 %v3702_v0 }
 0x250   :  { %2916 = vmatpush3.msra.mxu1 %v3916_v49 }
 0x251   :  { %2917 = vmatprep.subr.mxu1 %v3702_v0 }
 0x252   :  { %2918 = vmatpush3.msra.mxu1 %v3927_v52 }
 0x253   :  { %2919 = vmatprep.subr.mxu1 %v3702_v0 }
 0x254   :  { %2920 = vmatpush3.msra.mxu1 %v3936_v55 }
 0x255   :  { %2921 = vmatprep.subr.mxu1 %v3702_v0 }
 0x256   :  { %2922 = vmatpush3.msra.mxu1 %v3947_v58 }
 0x257   :  { %2923 = vmatprep.subr.mxu1 %v3702_v0 }
 0x258   :  { %2924 = vmatpush3.msra.mxu1 %v3957_v61 }
 0x259   :  { %2925 = vmatprep.subr.mxu1 %v3702_v0 }
 0x25a   :  { %2926 = vmatpush3.msra.mxu1 %v3969_v1 }
 0x25b   :  { %2927 = vmatprep.subr.mxu1 %v3702_v0 }
 0x25c   :  { %2928 = vmatpush3.msra.mxu1 %v3979_v7 }
 0x25d   :  { %2929 = vmatprep.subr.mxu1 %v3702_v0 }
 0x25e   :  { %2930 = vmatpush3.msra.mxu1 %v3986_v11 }
 0x25f   :  { %2931 = vmatprep.subr.mxu1 %v3702_v0 }
 0x260   :  { %2932 = vmatpush3.msra.mxu1 %v3994_v15 }
 0x261   :  { %2933 = vmatprep.subr.mxu1 %v3702_v0 }
 0x262   :  { %2934 = vmatpush3.msra.mxu1 %v4000_v17 }
 0x263   :  { %2973 = vmatprep.subr.mxu1 %v3702_v0 }
 0x2c5   :  { %v724_v32 = vpop.f32.mrf.mxu0 }
 0x2c7   :  { %v2832_v51 = vpop.f32.mrf.mxu0 }
 0x2e3   :  { %v654_v34 = vpop.f32.mrf.mxu1 }
 0x2e4   :  { %v655_v27 = vadd.f32 %v4135_v25, %v654_v34 }
 0x2e5   :  { %v2797_v29 = vpop.f32.mrf.mxu1 }
 0x2e6   :  { %v728_v30 = vadd.f32 %v724_v32, %v655_v27  ;;  %v208_v32 = vadd.f32 %v4049_v23, %v4122_v57 }
 0x2e8   :  { %3513 = vtanh.f32 %v728_v30  ;;  %v4527_v30 = vld [vmem:[#allocation7 + $0x48] sm:$0xff] }
 0x2f5   :  { %v3514_v19 = vpop.eup %3513 }
 0x2f6   :  { %2936 = vmatmul.mubr.f32.vlgmr.msra.gmra.mxu1 %v3514_v19 }
 0x2f7   :  { %2974 = vmatpush3.msra.mxu1 %v3856_v35  ;;  %3005 = vmatprep.mubr.msk.f32.mxu1 %vm3703_vm0, %v3702_v0 }
 0x2f8   :  { %2975 = vmatprep.subr.mxu1 %v3702_v0 }
 0x2f9   :  { %2976 = vmatpush3.msra.mxu1 %v3862_v37 }
 0x2fa   :  { %2977 = vmatprep.subr.mxu1 %v3702_v0 }
 0x2fb   :  { %2978 = vmatpush3.msra.mxu1 %v3870_v39 }
 0x2fc   :  { %2979 = vmatprep.subr.mxu1 %v3702_v0 }
 0x2fd   :  { %2980 = vmatpush3.msra.mxu1 %v3878_v41 }
 0x2fe   :  { %2981 = vmatprep.subr.mxu1 %v3702_v0 }
 0x2ff   :  { %2982 = vmatpush3.msra.mxu1 %v3886_v43 }
 0x300   :  { %2983 = vmatprep.subr.mxu1 %v3702_v0 }
 0x301   :  { %2984 = vmatpush3.msra.mxu1 %v3892_v44 }
 0x302   :  { %2985 = vmatprep.subr.mxu1 %v3702_v0 }
 0x303   :  { %v798_v51 = vpop.f32.mrf.mxu1  ;;  %2986 = vmatpush3.msra.mxu1 %v3904_v46 }
 0x304   :  { %v802_v34 = vadd.f32 %v798_v51, %v208_v32  ;;  %2987 = vmatprep.subr.mxu1 %v3702_v0  ;;  %v4531_v51 = vld [vmem:[#allocation7 + $0x40] sm:$0xff] }
 0x305   :  { %v2867_v27 = vpop.f32.mrf.mxu1  ;;  %2988 = vmatpush3.msra.mxu1 %v3912_v48 }
 0x306   :  { %3515 = vtanh.f32 %v802_v34  ;;  %2989 = vmatprep.subr.mxu1 %v3702_v0  ;;  %v4535_v34 = vld [vmem:[#allocation7 + $0x38] sm:$0xff]  ;;  %v4547_v27 = vld [vmem:[#allocation7 + $0x20] sm:$0xff] }
 0x307   :  { %2990 = vmatpush3.msra.mxu1 %v3920_v50 }
 0x308   :  { %2991 = vmatprep.subr.mxu1 %v3702_v0 }
 0x309   :  { %2992 = vmatpush3.msra.mxu1 %v3933_v54 }
 0x30a   :  { %2993 = vmatprep.subr.mxu1 %v3702_v0 }
 0x30b   :  { %2994 = vmatpush3.msra.mxu1 %v3938_v56 }
 0x30c   :  { %2995 = vmatprep.subr.mxu1 %v3702_v0 }
 0x30d   :  { %2996 = vmatpush3.msra.mxu1 %v3954_v60 }
 0x30e   :  { %2997 = vmatprep.subr.mxu1 %v3702_v0 }
 0x30f   :  { %2998 = vmatpush3.msra.mxu1 %v3960_v62 }
 0x310   :  { %2999 = vmatprep.subr.mxu1 %v3702_v0 }
 0x311   :  { %3000 = vmatpush3.msra.mxu1 %v3976_v5 }
 0x312   :  { %3001 = vmatprep.subr.mxu1 %v3702_v0 }
 0x313   :  { %v3516_v57 = vpop.eup %3515  ;;  %3002 = vmatpush3.msra.mxu1 %v3982_v9 }
 0x314   :  { %2901 = vmatmul.mubr.f32.vlgmr.msra.gmra.mxu0 %v3516_v57  ;;  %3003 = vmatprep.subr.mxu1 %v3702_v0 }
 0x315   :  { %2939 = vmatpush3.msra.mxu0 %v3787_v3  ;;  %2970 = vmatprep.mubr.msk.f32.mxu0 %vm3703_vm0, %v3702_v0 }
 0x316   :  { %2940 = vmatprep.subr.mxu0 %v3702_v0  ;;  %3004 = vmatpush3.msra.mxu1 %v3990_v13 }
 0x317   :  { %2941 = vmatpush3.msra.mxu0 %v3790_v4  ;;  %3043 = vmatprep.subr.mxu1 %v3702_v0 }
 0x318   :  { %2942 = vmatprep.subr.mxu0 %v3702_v0 }
 0x319   :  { %2943 = vmatpush3.msra.mxu0 %v3793_v6 }
 0x31a   :  { %2944 = vmatprep.subr.mxu0 %v3702_v0 }
 0x31b   :  { %2945 = vmatpush3.msra.mxu0 %v3797_v8 }
 0x31c   :  { %2946 = vmatprep.subr.mxu0 %v3702_v0 }
 0x31d   :  { %2947 = vmatpush3.msra.mxu0 %v3801_v10 }
 0x31e   :  { %2948 = vmatprep.subr.mxu0 %v3702_v0 }
 0x31f   :  { %2949 = vmatpush3.msra.mxu0 %v3805_v12 }
 0x320   :  { %2950 = vmatprep.subr.mxu0 %v3702_v0 }
 0x321   :  { %2951 = vmatpush3.msra.mxu0 %v3809_v14 }
 0x322   :  { %2952 = vmatprep.subr.mxu0 %v3702_v0 }
 0x323   :  { %2953 = vmatpush3.msra.mxu0 %v3813_v16  ;;  %v213_v16 = vadd.f32 %v4120_v53, %v4049_v23  ;;  %v218_v53 = vadd.f32 %v4049_v23, %v4126_v63  ;;  %v4539_v23 = vld [vmem:[#allocation7 + $0x30] sm:$0xff]  ;;  %v4543_v63 = vld [vmem:[#allocation7 + $0x28] sm:$0xff] }
 0x324   :  { %2954 = vmatprep.subr.mxu0 %v3702_v0 }
 0x325   :  { %2955 = vmatpush3.msra.mxu0 %v3817_v18 }
 0x326   :  { %2956 = vmatprep.subr.mxu0 %v3702_v0 }
 0x327   :  { %2957 = vmatpush3.msra.mxu0 %v3821_v20 }
 0x328   :  { %2958 = vmatprep.subr.mxu0 %v3702_v0 }
 0x329   :  { %2959 = vmatpush3.msra.mxu0 %v3825_v22 }
 0x32a   :  { %2960 = vmatprep.subr.mxu0 %v3702_v0 }
 0x32b   :  { %2961 = vmatpush3.msra.mxu0 %v3829_v24 }
 0x32c   :  { %2962 = vmatprep.subr.mxu0 %v3702_v0 }
 0x32d   :  { %2963 = vmatpush3.msra.mxu0 %v3833_v26  ;;  %v4382_v26 = vld [vmem:[#allocation5 + $0x78] sm:$0xff] }
 0x32e   :  { %2964 = vmatprep.subr.mxu0 %v3702_v0 }
 0x32f   :  { %2965 = vmatpush3.msra.mxu0 %v3837_v28  ;;  %v4389_v28 = vld [vmem:[#allocation5 + $0x70] sm:$0xff] }
 0x330   :  { %2966 = vmatprep.subr.mxu0 %v3702_v0 }
 0x331   :  { %2967 = vmatpush3.msra.mxu0 %v3845_v31  ;;  %v4394_v31 = vld [vmem:[#allocation5 + $0x68] sm:$0xff] }
 0x332   :  { %2968 = vmatprep.subr.mxu0 %v3702_v0 }
 0x333   :  { %2969 = vmatpush3.msra.mxu0 %v3848_v33  ;;  %v4398_v33 = vld [vmem:[#allocation5 + $0x60] sm:$0xff] }
 0x334   :  { %2971 = vmatmul.mubr.f32.vlgmr.msra.gmra.mxu0 %v3516_v57  ;;  %3008 = vmatprep.subr.mxu0 %v3702_v0  ;;  %v4551_v57 = vld [vmem:[#allocation7 + $0x18] sm:$0xff] }
 0x335   :  { %3009 = vmatpush3.msra.mxu0 %v3858_v36  ;;  %3040 = vmatprep.mubr.msk.f32.mxu0 %vm3703_vm0, %v3702_v0  ;;  %v4406_v36 = vld [vmem:[#allocation5 + $0x50] sm:$0xff] }
 0x336   :  { %3010 = vmatprep.subr.mxu0 %v3702_v0 }
 0x337   :  { %3011 = vmatpush3.msra.mxu0 %v3865_v38  ;;  %v4414_v38 = vld [vmem:[#allocation5 + $0x40] sm:$0xff] }
 0x338   :  { %3012 = vmatprep.subr.mxu0 %v3702_v0 }
 0x339   :  { %3013 = vmatpush3.msra.mxu0 %v3873_v40  ;;  %v4422_v40 = vld [vmem:[#allocation5 + $0x30] sm:$0xff] }
 0x33a   :  { %3014 = vmatprep.subr.mxu0 %v3702_v0 }
 0x33b   :  { %3015 = vmatpush3.msra.mxu0 %v3881_v42  ;;  %v4430_v42 = vld [vmem:[#allocation5 + $0x20] sm:$0xff] }
 0x33c   :  { %3016 = vmatprep.subr.mxu0 %v3702_v0 }
 0x33d   :  { %3017 = vmatpush3.msra.mxu0 %v3901_v45  ;;  %v4442_v45 = vld [vmem:[#allocation5 + $0x8] sm:$0xff] }
 0x33e   :  { %3018 = vmatprep.subr.mxu0 %v3702_v0 }
 0x33f   :  { %3019 = vmatpush3.msra.mxu0 %v3908_v47  ;;  %v4450_v47 = vld [vmem:[#allocation8 + $0x78] sm:$0xff] }
 0x340   :  { %3020 = vmatprep.subr.mxu0 %v3702_v0 }
 0x341   :  { %3021 = vmatpush3.msra.mxu0 %v3916_v49  ;;  %v4460_v49 = vld [vmem:[#allocation8 + $0x68] sm:$0xff] }
 0x342   :  { %3022 = vmatprep.subr.mxu0 %v3702_v0 }
 0x343   :  { %3023 = vmatpush3.msra.mxu0 %v3927_v52 }
 0x344   :  { %3024 = vmatprep.subr.mxu0 %v3702_v0 }
 0x345   :  { %3025 = vmatpush3.msra.mxu0 %v3936_v55 }
 0x346   :  { %3026 = vmatprep.subr.mxu0 %v3702_v0 }
 0x347   :  { %3027 = vmatpush3.msra.mxu0 %v3947_v58 }
 0x348   :  { %3028 = vmatprep.subr.mxu0 %v3702_v0 }
 0x349   :  { %3029 = vmatpush3.msra.mxu0 %v3957_v61 }
 0x34a   :  { %3030 = vmatprep.subr.mxu0 %v3702_v0 }
 0x34b   :  { %3031 = vmatpush3.msra.mxu0 %v3969_v1 }
 0x34c   :  { %3032 = vmatprep.subr.mxu0 %v3702_v0 }
 0x34d   :  { %3033 = vmatpush3.msra.mxu0 %v3979_v7 }
 0x34e   :  { %3034 = vmatprep.subr.mxu0 %v3702_v0 }
 0x34f   :  { %3035 = vmatpush3.msra.mxu0 %v3986_v11 }
 0x350   :  { %3036 = vmatprep.subr.mxu0 %v3702_v0 }
 0x351   :  { %3037 = vmatpush3.msra.mxu0 %v3994_v15 }
 0x352   :  { %3038 = vmatprep.subr.mxu0 %v3702_v0 }
 0x353   :  { %3039 = vmatpush3.msra.mxu0 %v4000_v17 }
 0x354   :  { %3078 = vmatprep.subr.mxu0 %v3702_v0 }
 0x3b6   :  { %v940_v3 = vpop.f32.mrf.mxu1 }
 0x3b8   :  { %v2937_v4 = vpop.f32.mrf.mxu1 }
 0x3d4   :  { %v870_v6 = vpop.f32.mrf.mxu0 }
 0x3d5   :  { %v871_v8 = vadd.f32 %v4135_v25, %v870_v6  ;;  %v4559_v6 = vld [vmem:[#allocation7 + $0x8] sm:$0xff] }
 0x3d6   :  { %v2902_v10 = vpop.f32.mrf.mxu0 }
 0x3d7   :  { %v944_v12 = vadd.f32 %v940_v3, %v871_v8  ;;  %v4555_v3 = vld [vmem:[#allocation7 + $0x10] sm:$0xff]  ;;  %v4567_v8 = vld [vmem:[#allocation7] sm:$0xff] }
 0x3d8   :  { %v4617_v10 = vld [vmem:[#allocation8 + $0x40] sm:$0xff] }
 0x3d9   :  { %3517 = vtanh.f32 %v944_v12  ;;  %v4621_v12 = vld [vmem:[#allocation8 + $0x38] sm:$0xff] }
 0x3e6   :  { %v3518_v14 = vpop.eup %3517 }
 0x3e7   :  { %3041 = vmatmul.mubr.f32.vlgmr.msra.gmra.mxu0 %v3518_v14  ;;  %v4625_v14 = vld [vmem:[#allocation8 + $0x30] sm:$0xff] }
 0x3e8   :  { %3079 = vmatpush3.msra.mxu0 %v3856_v35  ;;  %3110 = vmatprep.mubr.msk.f32.mxu0 %vm3703_vm0, %v3702_v0  ;;  %v4402_v35 = vld [vmem:[#allocation5 + $0x58] sm:$0xff] }
 0x3e9   :  { %3080 = vmatprep.subr.mxu0 %v3702_v0 }
 0x3ea   :  { %3081 = vmatpush3.msra.mxu0 %v3862_v37  ;;  %v4410_v37 = vld [vmem:[#allocation5 + $0x48] sm:$0xff] }
 0x3eb   :  { %3082 = vmatprep.subr.mxu0 %v3702_v0 }
 0x3ec   :  { %3083 = vmatpush3.msra.mxu0 %v3870_v39  ;;  %v4418_v39 = vld [vmem:[#allocation5 + $0x38] sm:$0xff] }
 0x3ed   :  { %3084 = vmatprep.subr.mxu0 %v3702_v0 }
 0x3ee   :  { %3085 = vmatpush3.msra.mxu0 %v3878_v41  ;;  %v4426_v41 = vld [vmem:[#allocation5 + $0x28] sm:$0xff] }
 0x3ef   :  { %3086 = vmatprep.subr.mxu0 %v3702_v0 }
 0x3f0   :  { %3087 = vmatpush3.msra.mxu0 %v3886_v43  ;;  %v4434_v43 = vld [vmem:[#allocation5 + $0x18] sm:$0xff] }
 0x3f1   :  { %3088 = vmatprep.subr.mxu0 %v3702_v0 }
 0x3f2   :  { %3089 = vmatpush3.msra.mxu0 %v3892_v44  ;;  %v4438_v44 = vld [vmem:[#allocation5 + $0x10] sm:$0xff] }
 0x3f3   :  { %3090 = vmatprep.subr.mxu0 %v3702_v0 }
 0x3f4   :  { %v1014_v18 = vpop.f32.mrf.mxu0  ;;  %3091 = vmatpush3.msra.mxu0 %v3904_v46  ;;  %v4446_v46 = vld [vmem:[#allocation5] sm:$0xff] }
 0x3f5   :  { %v1018_v20 = vadd.f32 %v1014_v18, %v213_v16  ;;  %3092 = vmatprep.subr.mxu0 %v3702_v0  ;;  %v4629_v16 = vld [vmem:[#allocation8 + $0x28] sm:$0xff]  ;;  %v4633_v18 = vld [vmem:[#allocation8 + $0x20] sm:$0xff] }
 0x3f6   :  { %v2972_v22 = vpop.f32.mrf.mxu0  ;;  %3093 = vmatpush3.msra.mxu0 %v3912_v48  ;;  %v4456_v48 = vld [vmem:[#allocation8 + $0x70] sm:$0xff] }
 0x3f7   :  { %3519 = vtanh.f32 %v1018_v20  ;;  %3094 = vmatprep.subr.mxu0 %v3702_v0  ;;  %v4637_v20 = vld [vmem:[#allocation8 + $0x18] sm:$0xff]  ;;  %v4641_v22 = vld [vmem:[#allocation8 + $0x10] sm:$0xff] }
 0x3f8   :  { %3095 = vmatpush3.msra.mxu0 %v3920_v50  ;;  %v4464_v50 = vld [vmem:[#allocation8 + $0x60] sm:$0xff] }
 0x3f9   :  { %3096 = vmatprep.subr.mxu0 %v3702_v0 }
 0x3fa   :  { %3097 = vmatpush3.msra.mxu0 %v3933_v54  ;;  %v4468_v54 = vld [vmem:[#allocation8 + $0x58] sm:$0xff] }
 0x3fb   :  { %3098 = vmatprep.subr.mxu0 %v3702_v0 }
 0x3fc   :  { %3099 = vmatpush3.msra.mxu0 %v3938_v56  ;;  %v4472_v56 = vld [vmem:[#allocation8 + $0x50] sm:$0xff] }
 0x3fd   :  { %3100 = vmatprep.subr.mxu0 %v3702_v0 }
 0x3fe   :  { %3101 = vmatpush3.msra.mxu0 %v3954_v60  ;;  %v4476_v60 = vld [vmem:[#allocation8 + $0x48] sm:$0xff] }
 0x3ff   :  { %3102 = vmatprep.subr.mxu0 %v3702_v0 }
 0x400   :  { %3103 = vmatpush3.msra.mxu0 %v3960_v62 }
 0x401   :  { %3104 = vmatprep.subr.mxu0 %v3702_v0 }
 0x402   :  { %3105 = vmatpush3.msra.mxu0 %v3976_v5 }
 0x403   :  { %3106 = vmatprep.subr.mxu0 %v3702_v0 }
 0x404   :  { %v3520_v24 = vpop.eup %3519  ;;  %3107 = vmatpush3.msra.mxu0 %v3982_v9  ;;  %v4505_v9 = vld [vmem:[#allocation7 + $0x70] sm:$0xff] }
 0x405   :  { %3006 = vmatmul.mubr.f32.vlgmr.msra.gmra.mxu1 %v3520_v24  ;;  %3108 = vmatprep.subr.mxu0 %v3702_v0 }
 0x406   :  { %3044 = vmatpush3.msra.mxu1 %v4382_v26  ;;  %3075 = vmatprep.mubr.msk.f32.mxu1 %vm3703_vm0, %v3702_v0 }
 0x407   :  { %3045 = vmatprep.subr.mxu1 %v3702_v0  ;;  %3109 = vmatpush3.msra.mxu0 %v3990_v13  ;;  %v4513_v13 = vld [vmem:[#allocation7 + $0x60] sm:$0xff] }
 0x408   :  { %3046 = vmatpush3.msra.mxu1 %v4389_v28  ;;  %3148 = vmatprep.subr.mxu0 %v3702_v0 }
 0x409   :  { %3047 = vmatprep.subr.mxu1 %v3702_v0 }
 0x40a   :  { %3048 = vmatpush3.msra.mxu1 %v4394_v31 }
 0x40b   :  { %3049 = vmatprep.subr.mxu1 %v3702_v0 }
 0x40c   :  { %3050 = vmatpush3.msra.mxu1 %v4398_v33 }
 0x40d   :  { %3051 = vmatprep.subr.mxu1 %v3702_v0 }
 0x40e   :  { %3052 = vmatpush3.msra.mxu1 %v4402_v35 }
 0x40f   :  { %3053 = vmatprep.subr.mxu1 %v3702_v0 }
 0x410   :  { %3054 = vmatpush3.msra.mxu1 %v4406_v36 }
 0x411   :  { %3055 = vmatprep.subr.mxu1 %v3702_v0 }
 0x412   :  { %3056 = vmatpush3.msra.mxu1 %v4410_v37 }
 0x413   :  { %3057 = vmatprep.subr.mxu1 %v3702_v0 }
 0x414   :  { %3058 = vmatpush3.msra.mxu1 %v4414_v38 }
 0x415   :  { %3059 = vmatprep.subr.mxu1 %v3702_v0 }
 0x416   :  { %3060 = vmatpush3.msra.mxu1 %v4418_v39 }
 0x417   :  { %3061 = vmatprep.subr.mxu1 %v3702_v0 }
 0x418   :  { %3062 = vmatpush3.msra.mxu1 %v4422_v40 }
 0x419   :  { %3063 = vmatprep.subr.mxu1 %v3702_v0 }
 0x41a   :  { %3064 = vmatpush3.msra.mxu1 %v4426_v41 }
 0x41b   :  { %3065 = vmatprep.subr.mxu1 %v3702_v0 }
 0x41c   :  { %3066 = vmatpush3.msra.mxu1 %v4430_v42 }
 0x41d   :  { %3067 = vmatprep.subr.mxu1 %v3702_v0 }
 0x41e   :  { %3068 = vmatpush3.msra.mxu1 %v4434_v43 }
 0x41f   :  { %3069 = vmatprep.subr.mxu1 %v3702_v0 }
 0x420   :  { %3070 = vmatpush3.msra.mxu1 %v4438_v44 }
 0x421   :  { %3071 = vmatprep.subr.mxu1 %v3702_v0 }
 0x422   :  { %3072 = vmatpush3.msra.mxu1 %v4442_v45 }
 0x423   :  { %3073 = vmatprep.subr.mxu1 %v3702_v0 }
 0x424   :  { %3074 = vmatpush3.msra.mxu1 %v4446_v46 }
 0x425   :  { %3076 = vmatmul.mubr.f32.vlgmr.msra.gmra.mxu1 %v3520_v24  ;;  %3113 = vmatprep.subr.mxu1 %v3702_v0  ;;  %v4645_v24 = vld [vmem:[#allocation8 + $0x8] sm:$0xff] }
 0x426   :  { %3114 = vmatpush3.msra.mxu1 %v4450_v47  ;;  %3145 = vmatprep.mubr.msk.f32.mxu1 %vm3703_vm0, %v3702_v0 }
 0x427   :  { %3115 = vmatprep.subr.mxu1 %v3702_v0 }
 0x428   :  { %3116 = vmatpush3.msra.mxu1 %v4456_v48 }
 0x429   :  { %3117 = vmatprep.subr.mxu1 %v3702_v0 }
 0x42a   :  { %3118 = vmatpush3.msra.mxu1 %v4460_v49 }
 0x42b   :  { %3119 = vmatprep.subr.mxu1 %v3702_v0 }
 0x42c   :  { %3120 = vmatpush3.msra.mxu1 %v4464_v50 }
 0x42d   :  { %3121 = vmatprep.subr.mxu1 %v3702_v0 }
 0x42e   :  { %3122 = vmatpush3.msra.mxu1 %v4468_v54 }
 0x42f   :  { %3123 = vmatprep.subr.mxu1 %v3702_v0 }
 0x430   :  { %3124 = vmatpush3.msra.mxu1 %v4472_v56 }
 0x431   :  { %3125 = vmatprep.subr.mxu1 %v3702_v0 }
 0x432   :  { %3126 = vmatpush3.msra.mxu1 %v4476_v60 }
 0x433   :  { %3127 = vmatprep.subr.mxu1 %v3702_v0 }
 0x434   :  { %3128 = vmatpush3.msra.mxu1 %v3927_v52 }
 0x435   :  { %3129 = vmatprep.subr.mxu1 %v3702_v0 }
 0x436   :  { %3130 = vmatpush3.msra.mxu1 %v3936_v55 }
 0x437   :  { %3131 = vmatprep.subr.mxu1 %v3702_v0 }
 0x438   :  { %3132 = vmatpush3.msra.mxu1 %v3947_v58 }
 0x439   :  { %3133 = vmatprep.subr.mxu1 %v3702_v0 }
 0x43a   :  { %3134 = vmatpush3.msra.mxu1 %v3957_v61 }
 0x43b   :  { %3135 = vmatprep.subr.mxu1 %v3702_v0 }
 0x43c   :  { %3136 = vmatpush3.msra.mxu1 %v3969_v1 }
 0x43d   :  { %3137 = vmatprep.subr.mxu1 %v3702_v0 }
 0x43e   :  { %3138 = vmatpush3.msra.mxu1 %v3979_v7  ;;  %v4499_v7 = vld [vmem:[#allocation7 + $0x78] sm:$0xff] }
 0x43f   :  { %3139 = vmatprep.subr.mxu1 %v3702_v0 }
 0x440   :  { %3140 = vmatpush3.msra.mxu1 %v3986_v11  ;;  %v4509_v11 = vld [vmem:[#allocation7 + $0x68] sm:$0xff] }
 0x441   :  { %3141 = vmatprep.subr.mxu1 %v3702_v0 }
 0x442   :  { %3142 = vmatpush3.msra.mxu1 %v3994_v15  ;;  %v4517_v15 = vld [vmem:[#allocation7 + $0x58] sm:$0xff] }
 0x443   :  { %3143 = vmatprep.subr.mxu1 %v3702_v0 }
 0x444   :  { %3144 = vmatpush3.msra.mxu1 %v4000_v17  ;;  %v4521_v17 = vld [vmem:[#allocation7 + $0x50] sm:$0xff] }
 0x445   :  { %3183 = vmatprep.subr.mxu1 %v3702_v0 }
 0x4a7   :  { %v1156_v52 = vpop.f32.mrf.mxu0 }
 0x4a9   :  { %v3042_v55 = vpop.f32.mrf.mxu0 }
 0x4c5   :  { %v1086_v58 = vpop.f32.mrf.mxu1 }
 0x4c6   :  { %v1087_v61 = vadd.f32 %v4135_v25, %v1086_v58 }
 0x4c7   :  { %v3007_v62 = vpop.f32.mrf.mxu1 }
 0x4c8   :  { %v1160_v1 = vadd.f32 %v1156_v52, %v1087_v61  ;;  %v4649_v52 = vld [vmem:[#allocation8] sm:$0xff] }
 0x4ca   :  { %3521 = vtanh.f32 %v1160_v1 }
 0x4d7   :  { %v3522_v5 = vpop.eup %3521 }
 0x4d8   :  { %3146 = vmatmul.mubr.f32.vlgmr.msra.gmra.mxu1 %v3522_v5 }
 0x4d9   :  { %3184 = vmatpush3.msra.mxu1 %v4499_v7  ;;  %3215 = vmatprep.mubr.msk.f32.mxu1 %vm3703_vm0, %v3702_v0 }
 0x4da   :  { %3185 = vmatprep.subr.mxu1 %v3702_v0 }
 0x4db   :  { %3186 = vmatpush3.msra.mxu1 %v4505_v9 }
 0x4dc   :  { %3187 = vmatprep.subr.mxu1 %v3702_v0 }
 0x4dd   :  { %3188 = vmatpush3.msra.mxu1 %v4509_v11 }
 0x4de   :  { %3189 = vmatprep.subr.mxu1 %v3702_v0 }
 0x4df   :  { %3190 = vmatpush3.msra.mxu1 %v4513_v13 }
 0x4e0   :  { %3191 = vmatprep.subr.mxu1 %v3702_v0 }
 0x4e1   :  { %3192 = vmatpush3.msra.mxu1 %v4517_v15 }
 0x4e2   :  { %3193 = vmatprep.subr.mxu1 %v3702_v0 }
 0x4e3   :  { %3194 = vmatpush3.msra.mxu1 %v4521_v17 }
 0x4e4   :  { %3195 = vmatprep.subr.mxu1 %v3702_v0 }
 0x4e5   :  { %v1230_v29 = vpop.f32.mrf.mxu1  ;;  %3196 = vmatpush3.msra.mxu1 %v4527_v30 }
 0x4e6   :  { %v1234_v19 = vadd.f32 %v1230_v29, %v218_v53  ;;  %3197 = vmatprep.subr.mxu1 %v3702_v0 }
 0x4e7   :  { %v3077_v32 = vpop.f32.mrf.mxu1  ;;  %3198 = vmatpush3.msra.mxu1 %v4531_v51 }
 0x4e8   :  { %3523 = vtanh.f32 %v1234_v19  ;;  %3199 = vmatprep.subr.mxu1 %v3702_v0 }
 0x4e9   :  { %3200 = vmatpush3.msra.mxu1 %v4535_v34 }
 0x4ea   :  { %3201 = vmatprep.subr.mxu1 %v3702_v0 }
 0x4eb   :  { %3202 = vmatpush3.msra.mxu1 %v4539_v23 }
 0x4ec   :  { %3203 = vmatprep.subr.mxu1 %v3702_v0 }
 0x4ed   :  { %3204 = vmatpush3.msra.mxu1 %v4543_v63 }
 0x4ee   :  { %3205 = vmatprep.subr.mxu1 %v3702_v0 }
 0x4ef   :  { %3206 = vmatpush3.msra.mxu1 %v4547_v27 }
 0x4f0   :  { %3207 = vmatprep.subr.mxu1 %v3702_v0 }
 0x4f1   :  { %3208 = vmatpush3.msra.mxu1 %v4551_v57 }
 0x4f2   :  { %3209 = vmatprep.subr.mxu1 %v3702_v0 }
 0x4f3   :  { %3210 = vmatpush3.msra.mxu1 %v4555_v3 }
 0x4f4   :  { %3211 = vmatprep.subr.mxu1 %v3702_v0 }
 0x4f5   :  { %v3524_v4 = vpop.eup %3523  ;;  %3212 = vmatpush3.msra.mxu1 %v4559_v6 }
 0x4f6   :  { %3111 = vmatmul.mubr.f32.vlgmr.msra.gmra.mxu0 %v3524_v4  ;;  %3213 = vmatprep.subr.mxu1 %v3702_v0 }
 0x4f7   :  { %3149 = vmatpush3.msra.mxu0 %v4382_v26  ;;  %3180 = vmatprep.mubr.msk.f32.mxu0 %vm3703_vm0, %v3702_v0 }
 0x4f8   :  { %3150 = vmatprep.subr.mxu0 %v3702_v0  ;;  %3214 = vmatpush3.msra.mxu1 %v4567_v8 }
 0x4f9   :  { %3151 = vmatpush3.msra.mxu0 %v4389_v28  ;;  %3253 = vmatprep.subr.mxu1 %v3702_v0 }
 0x4fa   :  { %3152 = vmatprep.subr.mxu0 %v3702_v0 }
 0x4fb   :  { %3153 = vmatpush3.msra.mxu0 %v4394_v31 }
 0x4fc   :  { %3154 = vmatprep.subr.mxu0 %v3702_v0 }
 0x4fd   :  { %3155 = vmatpush3.msra.mxu0 %v4398_v33 }
 0x4fe   :  { %3156 = vmatprep.subr.mxu0 %v3702_v0 }
 0x4ff   :  { %3157 = vmatpush3.msra.mxu0 %v4402_v35 }
 0x500   :  { %3158 = vmatprep.subr.mxu0 %v3702_v0 }
 0x501   :  { %3159 = vmatpush3.msra.mxu0 %v4406_v36 }
 0x502   :  { %3160 = vmatprep.subr.mxu0 %v3702_v0 }
 0x503   :  { %3161 = vmatpush3.msra.mxu0 %v4410_v37 }
 0x504   :  { %3162 = vmatprep.subr.mxu0 %v3702_v0 }
 0x505   :  { %3163 = vmatpush3.msra.mxu0 %v4414_v38 }
 0x506   :  { %3164 = vmatprep.subr.mxu0 %v3702_v0 }
 0x507   :  { %3165 = vmatpush3.msra.mxu0 %v4418_v39 }
 0x508   :  { %3166 = vmatprep.subr.mxu0 %v3702_v0 }
 0x509   :  { %3167 = vmatpush3.msra.mxu0 %v4422_v40 }
 0x50a   :  { %3168 = vmatprep.subr.mxu0 %v3702_v0 }
 0x50b   :  { %3169 = vmatpush3.msra.mxu0 %v4426_v41 }
 0x50c   :  { %3170 = vmatprep.subr.mxu0 %v3702_v0 }
 0x50d   :  { %3171 = vmatpush3.msra.mxu0 %v4430_v42 }
 0x50e   :  { %3172 = vmatprep.subr.mxu0 %v3702_v0 }
 0x50f   :  { %3173 = vmatpush3.msra.mxu0 %v4434_v43 }
 0x510   :  { %3174 = vmatprep.subr.mxu0 %v3702_v0 }
 0x511   :  { %3175 = vmatpush3.msra.mxu0 %v4438_v44 }
 0x512   :  { %3176 = vmatprep.subr.mxu0 %v3702_v0 }
 0x513   :  { %3177 = vmatpush3.msra.mxu0 %v4442_v45 }
 0x514   :  { %3178 = vmatprep.subr.mxu0 %v3702_v0 }
 0x515   :  { %3179 = vmatpush3.msra.mxu0 %v4446_v46 }
 0x516   :  { %3181 = vmatmul.mubr.f32.vlgmr.msra.gmra.mxu0 %v3524_v4  ;;  %3218 = vmatprep.subr.mxu0 %v3702_v0 }
 0x517   :  { %3219 = vmatpush3.msra.mxu0 %v4450_v47  ;;  %3250 = vmatprep.mubr.msk.f32.mxu0 %vm3703_vm0, %v3702_v0 }
 0x518   :  { %3220 = vmatprep.subr.mxu0 %v3702_v0 }
 0x519   :  { %3221 = vmatpush3.msra.mxu0 %v4456_v48 }
 0x51a   :  { %3222 = vmatprep.subr.mxu0 %v3702_v0 }
 0x51b   :  { %3223 = vmatpush3.msra.mxu0 %v4460_v49 }
 0x51c   :  { %3224 = vmatprep.subr.mxu0 %v3702_v0 }
 0x51d   :  { %3225 = vmatpush3.msra.mxu0 %v4464_v50 }
 0x51e   :  { %3226 = vmatprep.subr.mxu0 %v3702_v0 }
 0x51f   :  { %3227 = vmatpush3.msra.mxu0 %v4468_v54 }
 0x520   :  { %3228 = vmatprep.subr.mxu0 %v3702_v0 }
 0x521   :  { %3229 = vmatpush3.msra.mxu0 %v4472_v56 }
 0x522   :  { %3230 = vmatprep.subr.mxu0 %v3702_v0 }
 0x523   :  { %3231 = vmatpush3.msra.mxu0 %v4476_v60 }
 0x524   :  { %3232 = vmatprep.subr.mxu0 %v3702_v0 }
 0x525   :  { %3233 = vmatpush3.msra.mxu0 %v4617_v10 }
 0x526   :  { %3234 = vmatprep.subr.mxu0 %v3702_v0 }
 0x527   :  { %3235 = vmatpush3.msra.mxu0 %v4621_v12 }
 0x528   :  { %3236 = vmatprep.subr.mxu0 %v3702_v0 }
 0x529   :  { %3237 = vmatpush3.msra.mxu0 %v4625_v14 }
 0x52a   :  { %3238 = vmatprep.subr.mxu0 %v3702_v0 }
 0x52b   :  { %3239 = vmatpush3.msra.mxu0 %v4629_v16 }
 0x52c   :  { %3240 = vmatprep.subr.mxu0 %v3702_v0 }
 0x52d   :  { %3241 = vmatpush3.msra.mxu0 %v4633_v18 }
 0x52e   :  { %3242 = vmatprep.subr.mxu0 %v3702_v0 }
 0x52f   :  { %3243 = vmatpush3.msra.mxu0 %v4637_v20 }
 0x530   :  { %3244 = vmatprep.subr.mxu0 %v3702_v0 }
 0x531   :  { %3245 = vmatpush3.msra.mxu0 %v4641_v22 }
 0x532   :  { %3246 = vmatprep.subr.mxu0 %v3702_v0 }
 0x533   :  { %3247 = vmatpush3.msra.mxu0 %v4645_v24 }
 0x534   :  { %3248 = vmatprep.subr.mxu0 %v3702_v0 }
 0x535   :  { %3249 = vmatpush3.msra.mxu0 %v4649_v52 }
 0x536   :  { %3288 = vmatprep.subr.mxu0 %v3702_v0 }
 0x598   :  { %v1372_v55 = vpop.f32.mrf.mxu1 }
 0x59a   :  { %v3147_v58 = vpop.f32.mrf.mxu1 }
 0x5b6   :  { %v1302_v61 = vpop.f32.mrf.mxu0 }
 0x5b7   :  { %v1303_v62 = vadd.f32 %v4135_v25, %v1302_v61  ;;  %v4670_v25 = vld [vmem:[%s4902_s3] ss:$0 sm:$0xff] }
 0x5b8   :  { %v3112_v1 = vpop.f32.mrf.mxu0  ;;  %v223_v29 = vadd.f32 %v4670_v25, %v4124_v59 }
 0x5b9   :  { %v1376_v5 = vadd.f32 %v1372_v55, %v1303_v62  ;;  %v4766_v62 = vld [vmem:[%s4905_s6] ss:$0 sm:$0xff] }
 0x5bb   :  { %3525 = vtanh.f32 %v1376_v5 }
 0x5c8   :  { %v3526_v53 = vpop.eup %3525 }
 0x5c9   :  { %3251 = vmatmul.mubr.f32.vlgmr.msra.gmra.mxu0 %v3526_v53 }
 0x5ca   :  { %3289 = vmatpush3.msra.mxu0 %v4499_v7  ;;  %3320 = vmatprep.mubr.msk.f32.mxu0 %vm3703_vm0, %v3702_v0 }
 0x5cb   :  { %3290 = vmatprep.subr.mxu0 %v3702_v0 }
 0x5cc   :  { %3291 = vmatpush3.msra.mxu0 %v4505_v9 }
 0x5cd   :  { %3292 = vmatprep.subr.mxu0 %v3702_v0 }
 0x5ce   :  { %3293 = vmatpush3.msra.mxu0 %v4509_v11 }
 0x5cf   :  { %3294 = vmatprep.subr.mxu0 %v3702_v0 }
 0x5d0   :  { %3295 = vmatpush3.msra.mxu0 %v4513_v13 }
 0x5d1   :  { %3296 = vmatprep.subr.mxu0 %v3702_v0 }
 0x5d2   :  { %3297 = vmatpush3.msra.mxu0 %v4517_v15 }
 0x5d3   :  { %3298 = vmatprep.subr.mxu0 %v3702_v0 }
 0x5d4   :  { %3299 = vmatpush3.msra.mxu0 %v4521_v17 }
 0x5d5   :  { %3300 = vmatprep.subr.mxu0 %v3702_v0 }
 0x5d6   :  { %v1446_v19 = vpop.f32.mrf.mxu0  ;;  %3301 = vmatpush3.msra.mxu0 %v4527_v30 }
 0x5d7   :  { %v1450_v32 = vadd.f32 %v1446_v19, %v223_v29  ;;  %3302 = vmatprep.subr.mxu0 %v3702_v0 }
 0x5d8   :  { %v3182_v4 = vpop.f32.mrf.mxu0  ;;  %3303 = vmatpush3.msra.mxu0 %v4531_v51 }
 0x5d9   :  { %3527 = vtanh.f32 %v1450_v32  ;;  %3304 = vmatprep.subr.mxu0 %v3702_v0 }
 0x5da   :  { %3305 = vmatpush3.msra.mxu0 %v4535_v34 }
 0x5db   :  { %3306 = vmatprep.subr.mxu0 %v3702_v0 }
 0x5dc   :  { %3307 = vmatpush3.msra.mxu0 %v4539_v23 }
 0x5dd   :  { %3308 = vmatprep.subr.mxu0 %v3702_v0 }
 0x5de   :  { %3309 = vmatpush3.msra.mxu0 %v4543_v63 }
 0x5df   :  { %3310 = vmatprep.subr.mxu0 %v3702_v0 }
 0x5e0   :  { %3311 = vmatpush3.msra.mxu0 %v4547_v27 }
 0x5e1   :  { %3312 = vmatprep.subr.mxu0 %v3702_v0 }
 0x5e2   :  { %3313 = vmatpush3.msra.mxu0 %v4551_v57 }
 0x5e3   :  { %3314 = vmatprep.subr.mxu0 %v3702_v0 }
 0x5e4   :  { %3315 = vmatpush3.msra.mxu0 %v4555_v3 }
 0x5e5   :  { %3316 = vmatprep.subr.mxu0 %v3702_v0 }
 0x5e6   :  { %v3528_v59 = vpop.eup %3527  ;;  %3317 = vmatpush3.msra.mxu0 %v4559_v6 }
 0x5e7   :  { %3216 = vmatmul.mubr.f32.vlgmr.msra.gmra.mxu1 %v3528_v59  ;;  %3318 = vmatprep.subr.mxu0 %v3702_v0 }
 0x5e8   :  { %3254 = vmatpush3.msra.mxu1 %v4382_v26  ;;  %3285 = vmatprep.mubr.msk.f32.mxu1 %vm3703_vm0, %v3702_v0 }
 0x5e9   :  { %3255 = vmatprep.subr.mxu1 %v3702_v0  ;;  %3319 = vmatpush3.msra.mxu0 %v4567_v8 }
 0x5ea   :  { %3256 = vmatpush3.msra.mxu1 %v4389_v28  ;;  %3358 = vmatprep.subr.mxu0 %v3702_v0 }
 0x5eb   :  { %3257 = vmatprep.subr.mxu1 %v3702_v0 }
 0x5ec   :  { %3258 = vmatpush3.msra.mxu1 %v4394_v31 }
 0x5ed   :  { %3259 = vmatprep.subr.mxu1 %v3702_v0 }
 0x5ee   :  { %3260 = vmatpush3.msra.mxu1 %v4398_v33 }
 0x5ef   :  { %3261 = vmatprep.subr.mxu1 %v3702_v0 }
 0x5f0   :  { %3262 = vmatpush3.msra.mxu1 %v4402_v35 }
 0x5f1   :  { %3263 = vmatprep.subr.mxu1 %v3702_v0 }
 0x5f2   :  { %3264 = vmatpush3.msra.mxu1 %v4406_v36 }
 0x5f3   :  { %3265 = vmatprep.subr.mxu1 %v3702_v0 }
 0x5f4   :  { %3266 = vmatpush3.msra.mxu1 %v4410_v37 }
 0x5f5   :  { %3267 = vmatprep.subr.mxu1 %v3702_v0 }
 0x5f6   :  { %3268 = vmatpush3.msra.mxu1 %v4414_v38 }
 0x5f7   :  { %3269 = vmatprep.subr.mxu1 %v3702_v0 }
 0x5f8   :  { %3270 = vmatpush3.msra.mxu1 %v4418_v39 }
 0x5f9   :  { %3271 = vmatprep.subr.mxu1 %v3702_v0 }
 0x5fa   :  { %3272 = vmatpush3.msra.mxu1 %v4422_v40 }
 0x5fb   :  { %3273 = vmatprep.subr.mxu1 %v3702_v0 }
 0x5fc   :  { %3274 = vmatpush3.msra.mxu1 %v4426_v41 }
 0x5fd   :  { %3275 = vmatprep.subr.mxu1 %v3702_v0 }
 0x5fe   :  { %3276 = vmatpush3.msra.mxu1 %v4430_v42 }
 0x5ff   :  { %3277 = vmatprep.subr.mxu1 %v3702_v0 }
 0x600   :  { %3278 = vmatpush3.msra.mxu1 %v4434_v43 }
 0x601   :  { %3279 = vmatprep.subr.mxu1 %v3702_v0 }
 0x602   :  { %3280 = vmatpush3.msra.mxu1 %v4438_v44 }
 0x603   :  { %3281 = vmatprep.subr.mxu1 %v3702_v0 }
 0x604   :  { %3282 = vmatpush3.msra.mxu1 %v4442_v45 }
 0x605   :  { %3283 = vmatprep.subr.mxu1 %v3702_v0 }
 0x606   :  { %3284 = vmatpush3.msra.mxu1 %v4446_v46 }
 0x607   :  { %3286 = vmatmul.mubr.f32.vlgmr.msra.gmra.mxu1 %v3528_v59  ;;  %3323 = vmatprep.subr.mxu1 %v3702_v0 }
 0x608   :  { %3324 = vmatpush3.msra.mxu1 %v4450_v47  ;;  %3355 = vmatprep.mubr.msk.f32.mxu1 %vm3703_vm0, %v3702_v0 }
 0x609   :  { %3325 = vmatprep.subr.mxu1 %v3702_v0 }
 0x60a   :  { %3326 = vmatpush3.msra.mxu1 %v4456_v48 }
 0x60b   :  { %3327 = vmatprep.subr.mxu1 %v3702_v0 }
 0x60c   :  { %3328 = vmatpush3.msra.mxu1 %v4460_v49 }
 0x60d   :  { %3329 = vmatprep.subr.mxu1 %v3702_v0 }
 0x60e   :  { %3330 = vmatpush3.msra.mxu1 %v4464_v50 }
 0x60f   :  { %3331 = vmatprep.subr.mxu1 %v3702_v0 }
 0x610   :  { %3332 = vmatpush3.msra.mxu1 %v4468_v54 }
 0x611   :  { %3333 = vmatprep.subr.mxu1 %v3702_v0 }
 0x612   :  { %3334 = vmatpush3.msra.mxu1 %v4472_v56 }
 0x613   :  { %3335 = vmatprep.subr.mxu1 %v3702_v0 }
 0x614   :  { %3336 = vmatpush3.msra.mxu1 %v4476_v60 }
 0x615   :  { %3337 = vmatprep.subr.mxu1 %v3702_v0 }
 0x616   :  { %3338 = vmatpush3.msra.mxu1 %v4617_v10 }
 0x617   :  { %3339 = vmatprep.subr.mxu1 %v3702_v0 }
 0x618   :  { %3340 = vmatpush3.msra.mxu1 %v4621_v12 }
 0x619   :  { %3341 = vmatprep.subr.mxu1 %v3702_v0 }
 0x61a   :  { %3342 = vmatpush3.msra.mxu1 %v4625_v14 }
 0x61b   :  { %3343 = vmatprep.subr.mxu1 %v3702_v0 }
 0x61c   :  { %3344 = vmatpush3.msra.mxu1 %v4629_v16 }
 0x61d   :  { %3345 = vmatprep.subr.mxu1 %v3702_v0 }
 0x61e   :  { %3346 = vmatpush3.msra.mxu1 %v4633_v18 }
 0x61f   :  { %3347 = vmatprep.subr.mxu1 %v3702_v0 }
 0x620   :  { %3348 = vmatpush3.msra.mxu1 %v4637_v20 }
 0x621   :  { %3349 = vmatprep.subr.mxu1 %v3702_v0 }
 0x622   :  { %3350 = vmatpush3.msra.mxu1 %v4641_v22 }
 0x623   :  { %3351 = vmatprep.subr.mxu1 %v3702_v0 }
 0x624   :  { %3352 = vmatpush3.msra.mxu1 %v4645_v24 }
 0x625   :  { %3353 = vmatprep.subr.mxu1 %v3702_v0 }
 0x626   :  { %3354 = vmatpush3.msra.mxu1 %v4649_v52 }
 0x627   :  { %3393 = vmatprep.subr.mxu1 %v3702_v0 }
 0x689   :  { %v1588_v55 = vpop.f32.mrf.mxu0 }
 0x68b   :  { %v3252_v58 = vpop.f32.mrf.mxu0 }
 0x6a7   :  { %v1518_v61 = vpop.f32.mrf.mxu1 }
 0x6a8   :  { %v1519_v1 = vadd.f32 %v4766_v62, %v1518_v61 }
 0x6a9   :  { %v3217_v5 = vpop.f32.mrf.mxu1 }
 0x6aa   :  { %v1592_v53 = vadd.f32 %v1588_v55, %v1519_v1 }
 0x6ac   :  { %3529 = vtanh.f32 %v1592_v53 }
 0x6b9   :  { %v3530_v29 = vpop.eup %3529 }
 0x6ba   :  { %3356 = vmatmul.mubr.f32.vlgmr.msra.gmra.mxu1 %v3530_v29 }
 0x6bb   :  { %3394 = vmatpush3.msra.mxu1 %v4499_v7  ;;  %3425 = vmatprep.mubr.msk.f32.mxu1 %vm3703_vm0, %v3702_v0  ;;  %v228_v7 = vadd.f32 %v4670_v25, %v4130_v21 }
 0x6bc   :  { %3395 = vmatprep.subr.mxu1 %v3702_v0 }
 0x6bd   :  { %3396 = vmatpush3.msra.mxu1 %v4505_v9 }
 0x6be   :  { %3397 = vmatprep.subr.mxu1 %v3702_v0 }
 0x6bf   :  { %3398 = vmatpush3.msra.mxu1 %v4509_v11 }
 0x6c0   :  { %3399 = vmatprep.subr.mxu1 %v3702_v0 }
 0x6c1   :  { %3400 = vmatpush3.msra.mxu1 %v4513_v13 }
 0x6c2   :  { %3401 = vmatprep.subr.mxu1 %v3702_v0 }
 0x6c3   :  { %3402 = vmatpush3.msra.mxu1 %v4517_v15  ;;  %v2029_v15 = vld [vmem:[#allocation10 + $0x18] sm:$0xff] }
 0x6c4   :  { %3403 = vmatprep.subr.mxu1 %v3702_v0 }
 0x6c5   :  { %3404 = vmatpush3.msra.mxu1 %v4521_v17  ;;  %v2028_v17 = vld [vmem:[#allocation10 + $0x10] sm:$0xff] }
 0x6c6   :  { %3405 = vmatprep.subr.mxu1 %v3702_v0 }
 0x6c7   :  { %v1662_v9 = vpop.f32.mrf.mxu1  ;;  %3406 = vmatpush3.msra.mxu1 %v4527_v30  ;;  %v2027_v30 = vld [vmem:[#allocation10 + $0x8] sm:$0xff] }
 0x6c8   :  { %v1666_v11 = vadd.f32 %v1662_v9, %v228_v7  ;;  %3407 = vmatprep.subr.mxu1 %v3702_v0 }
 0x6c9   :  { %v3287_v13 = vpop.f32.mrf.mxu1  ;;  %3408 = vmatpush3.msra.mxu1 %v4531_v51  ;;  %v2026_v51 = vld [vmem:[#allocation10] sm:$0xff] }
 0x6ca   :  { %3531 = vtanh.f32 %v1666_v11  ;;  %3409 = vmatprep.subr.mxu1 %v3702_v0 }
 0x6cb   :  { %3410 = vmatpush3.msra.mxu1 %v4535_v34 }
 0x6cc   :  { %3411 = vmatprep.subr.mxu1 %v3702_v0 }
 0x6cd   :  { %3412 = vmatpush3.msra.mxu1 %v4539_v23 }
 0x6ce   :  { %3413 = vmatprep.subr.mxu1 %v3702_v0 }
 0x6cf   :  { %3414 = vmatpush3.msra.mxu1 %v4543_v63 }
 0x6d0   :  { %3415 = vmatprep.subr.mxu1 %v3702_v0 }
 0x6d1   :  { %3416 = vmatpush3.msra.mxu1 %v4547_v27 }
 0x6d2   :  { %3417 = vmatprep.subr.mxu1 %v3702_v0 }
 0x6d3   :  { %3418 = vmatpush3.msra.mxu1 %v4551_v57 }
 0x6d4   :  { %3419 = vmatprep.subr.mxu1 %v3702_v0 }
 0x6d5   :  { %3420 = vmatpush3.msra.mxu1 %v4555_v3 }
 0x6d6   :  { %3421 = vmatprep.subr.mxu1 %v3702_v0 }
 0x6d7   :  { %v3532_v21 = vpop.eup %3531  ;;  %3422 = vmatpush3.msra.mxu1 %v4559_v6 }
 0x6d8   :  { %3321 = vmatmul.mubr.f32.vlgmr.msra.gmra.mxu0 %v3532_v21  ;;  %3423 = vmatprep.subr.mxu1 %v3702_v0 }
 0x6d9   :  { %3359 = vmatpush3.msra.mxu0 %v4382_v26  ;;  %3390 = vmatprep.mubr.msk.f32.mxu0 %vm3703_vm0, %v3702_v0 }
 0x6da   :  { %3360 = vmatprep.subr.mxu0 %v3702_v0  ;;  %3424 = vmatpush3.msra.mxu1 %v4567_v8  ;;  %v2129_v8 = vld [vmem:[%s4907_s8] ss:$0 sm:$0xff] }
 0x6db   :  { %3361 = vmatpush3.msra.mxu0 %v4389_v28  ;;  %3463 = vmatprep.subr.mxu1 %v3702_v0 }
 0x6dc   :  { %3362 = vmatprep.subr.mxu0 %v3702_v0 }
 0x6dd   :  { %3363 = vmatpush3.msra.mxu0 %v4394_v31 }
 0x6de   :  { %3364 = vmatprep.subr.mxu0 %v3702_v0 }
 0x6df   :  { %3365 = vmatpush3.msra.mxu0 %v4398_v33 }
 0x6e0   :  { %3366 = vmatprep.subr.mxu0 %v3702_v0 }
 0x6e1   :  { %3367 = vmatpush3.msra.mxu0 %v4402_v35 }
 0x6e2   :  { %3368 = vmatprep.subr.mxu0 %v3702_v0 }
 0x6e3   :  { %3369 = vmatpush3.msra.mxu0 %v4406_v36 }
 0x6e4   :  { %3370 = vmatprep.subr.mxu0 %v3702_v0 }
 0x6e5   :  { %3371 = vmatpush3.msra.mxu0 %v4410_v37 }
 0x6e6   :  { %3372 = vmatprep.subr.mxu0 %v3702_v0 }
 0x6e7   :  { %3373 = vmatpush3.msra.mxu0 %v4414_v38  ;;  %v233_v38 = vadd.f32 %v4670_v25, %v4128_v2  ;;  %v2037_v2 = vld [vmem:[#allocation10 + $0x58] sm:$0xff] }
 0x6e8   :  { %3374 = vmatprep.subr.mxu0 %v3702_v0 }
 0x6e9   :  { %3375 = vmatpush3.msra.mxu0 %v4418_v39 }
 0x6ea   :  { %3376 = vmatprep.subr.mxu0 %v3702_v0 }
 0x6eb   :  { %3377 = vmatpush3.msra.mxu0 %v4422_v40 }
 0x6ec   :  { %3378 = vmatprep.subr.mxu0 %v3702_v0 }
 0x6ed   :  { %3379 = vmatpush3.msra.mxu0 %v4426_v41 }
 0x6ee   :  { %3380 = vmatprep.subr.mxu0 %v3702_v0 }
 0x6ef   :  { %3381 = vmatpush3.msra.mxu0 %v4430_v42 }
 0x6f0   :  { %3382 = vmatprep.subr.mxu0 %v3702_v0 }
 0x6f1   :  { %3383 = vmatpush3.msra.mxu0 %v4434_v43  ;;  %v2041_v43 = vld [vmem:[#allocation10 + $0x78] sm:$0xff] }
 0x6f2   :  { %3384 = vmatprep.subr.mxu0 %v3702_v0 }
 0x6f3   :  { %3385 = vmatpush3.msra.mxu0 %v4438_v44  ;;  %v2040_v44 = vld [vmem:[#allocation10 + $0x70] sm:$0xff] }
 0x6f4   :  { %3386 = vmatprep.subr.mxu0 %v3702_v0 }
 0x6f5   :  { %3387 = vmatpush3.msra.mxu0 %v4442_v45  ;;  %v2039_v45 = vld [vmem:[#allocation10 + $0x68] sm:$0xff] }
 0x6f6   :  { %3388 = vmatprep.subr.mxu0 %v3702_v0 }
 0x6f7   :  { %3389 = vmatpush3.msra.mxu0 %v4446_v46  ;;  %v2038_v46 = vld [vmem:[#allocation10 + $0x60] sm:$0xff] }
 0x6f8   :  { %3391 = vmatmul.mubr.f32.vlgmr.msra.gmra.mxu0 %v3532_v21  ;;  %3428 = vmatprep.subr.mxu0 %v3702_v0 }
 0x6f9   :  { %3429 = vmatpush3.msra.mxu0 %v4450_v47  ;;  %3460 = vmatprep.mubr.msk.f32.mxu0 %vm3703_vm0, %v3702_v0  ;;  %v2036_v47 = vld [vmem:[#allocation10 + $0x50] sm:$0xff] }
 0x6fa   :  { %3430 = vmatprep.subr.mxu0 %v3702_v0 }
 0x6fb   :  { %3431 = vmatpush3.msra.mxu0 %v4456_v48  ;;  %v2035_v48 = vld [vmem:[#allocation10 + $0x48] sm:$0xff] }
 0x6fc   :  { %3432 = vmatprep.subr.mxu0 %v3702_v0 }
 0x6fd   :  { %3433 = vmatpush3.msra.mxu0 %v4460_v49  ;;  %v2034_v49 = vld [vmem:[#allocation10 + $0x40] sm:$0xff] }
 0x6fe   :  { %3434 = vmatprep.subr.mxu0 %v3702_v0 }
 0x6ff   :  { %3435 = vmatpush3.msra.mxu0 %v4464_v50  ;;  %v2033_v50 = vld [vmem:[#allocation10 + $0x38] sm:$0xff] }
 0x700   :  { %3436 = vmatprep.subr.mxu0 %v3702_v0 }
 0x701   :  { %3437 = vmatpush3.msra.mxu0 %v4468_v54  ;;  %v2032_v54 = vld [vmem:[#allocation10 + $0x30] sm:$0xff] }
 0x702   :  { %3438 = vmatprep.subr.mxu0 %v3702_v0 }
 0x703   :  { %3439 = vmatpush3.msra.mxu0 %v4472_v56  ;;  %v2031_v56 = vld [vmem:[#allocation10 + $0x28] sm:$0xff] }
 0x704   :  { %3440 = vmatprep.subr.mxu0 %v3702_v0 }
 0x705   :  { %3441 = vmatpush3.msra.mxu0 %v4476_v60  ;;  %v2030_v60 = vld [vmem:[#allocation10 + $0x20] sm:$0xff] }
 0x706   :  { %3442 = vmatprep.subr.mxu0 %v3702_v0 }
 0x707   :  { %3443 = vmatpush3.msra.mxu0 %v4617_v10 }
 0x708   :  { %3444 = vmatprep.subr.mxu0 %v3702_v0 }
 0x709   :  { %3445 = vmatpush3.msra.mxu0 %v4621_v12 }
 0x70a   :  { %3446 = vmatprep.subr.mxu0 %v3702_v0 }
 0x70b   :  { %3447 = vmatpush3.msra.mxu0 %v4625_v14 }
 0x70c   :  { %3448 = vmatprep.subr.mxu0 %v3702_v0 }
 0x70d   :  { %3449 = vmatpush3.msra.mxu0 %v4629_v16 }
 0x70e   :  { %3450 = vmatprep.subr.mxu0 %v3702_v0 }
 0x70f   :  { %3451 = vmatpush3.msra.mxu0 %v4633_v18 }
 0x710   :  { %3452 = vmatprep.subr.mxu0 %v3702_v0 }
 0x711   :  { %3453 = vmatpush3.msra.mxu0 %v4637_v20 }
 0x712   :  { %3454 = vmatprep.subr.mxu0 %v3702_v0 }
 0x713   :  { %3455 = vmatpush3.msra.mxu0 %v4641_v22 }
 0x714   :  { %3456 = vmatprep.subr.mxu0 %v3702_v0 }
 0x715   :  { %3457 = vmatpush3.msra.mxu0 %v4645_v24 }
 0x716   :  { %3458 = vmatprep.subr.mxu0 %v3702_v0 }
 0x717   :  { %3459 = vmatpush3.msra.mxu0 %v4649_v52 }
 0x77a   :  { %v1804_v26 = vpop.f32.mrf.mxu1 }
 0x77c   :  { %v3357_v28 = vpop.f32.mrf.mxu1 }
 0x798   :  { %v1734_v31 = vpop.f32.mrf.mxu0 }
 0x799   :  { %v1735_v33 = vadd.f32 %v4766_v62, %v1734_v31 }
 0x79a   :  { %v3322_v35 = vpop.f32.mrf.mxu0 }
 0x79b   :  { %v1808_v36 = vadd.f32 %v1804_v26, %v1735_v33 }
 0x79d   :  { %3533 = vtanh.f32 %v1808_v36 }
 0x7aa   :  { %v3534_v37 = vpop.eup %3533 }
 0x7ab   :  { %3461 = vmatmul.mubr.f32.vlgmr.msra.gmra.mxu0 %v3534_v37 }
 0x7b8   :  { %v1878_v39 = vpop.f32.mrf.mxu0 }
 0x7b9   :  { %v1882_v40 = vadd.f32 %v1878_v39, %v233_v38 }
 0x7ba   :  { %v3392_v41 = vpop.f32.mrf.mxu0 }
 0x7bb   :  { %3535 = vtanh.f32 %v1882_v40 }
 0x7c8   :  { %v3536_v42 = vpop.eup %3535 }
 0x7c9   :  { %3426 = vmatmul.mubr.f32.vlgmr.msra.gmra.mxu1 %v3536_v42 }
 0x7ca   :  { %3495 = vmatprep.mubr.msk.f32.mxu1 %vm3703_vm0, %v3702_v0  ;;  %3464 = vmatpush3.msra.mxu1 %v2041_v43 }
 0x7cb   :  { %3465 = vmatprep.subr.mxu1 %v3702_v0 }
 0x7cc   :  { %3466 = vmatpush3.msra.mxu1 %v2040_v44 }
 0x7cd   :  { %3467 = vmatprep.subr.mxu1 %v3702_v0 }
 0x7ce   :  { %3468 = vmatpush3.msra.mxu1 %v2039_v45 }
 0x7cf   :  { %3469 = vmatprep.subr.mxu1 %v3702_v0 }
 0x7d0   :  { %3470 = vmatpush3.msra.mxu1 %v2038_v46 }
 0x7d1   :  { %3471 = vmatprep.subr.mxu1 %v3702_v0 }
 0x7d2   :  { %3472 = vmatpush3.msra.mxu1 %v2037_v2 }
 0x7d3   :  { %3473 = vmatprep.subr.mxu1 %v3702_v0 }
 0x7d4   :  { %3474 = vmatpush3.msra.mxu1 %v2036_v47 }
 0x7d5   :  { %3475 = vmatprep.subr.mxu1 %v3702_v0 }
 0x7d6   :  { %3476 = vmatpush3.msra.mxu1 %v2035_v48 }
 0x7d7   :  { %3477 = vmatprep.subr.mxu1 %v3702_v0 }
 0x7d8   :  { %3478 = vmatpush3.msra.mxu1 %v2034_v49 }
 0x7d9   :  { %3479 = vmatprep.subr.mxu1 %v3702_v0 }
 0x7da   :  { %3480 = vmatpush3.msra.mxu1 %v2033_v50 }
 0x7db   :  { %3481 = vmatprep.subr.mxu1 %v3702_v0 }
 0x7dc   :  { %3482 = vmatpush3.msra.mxu1 %v2032_v54 }
 0x7dd   :  { %3483 = vmatprep.subr.mxu1 %v3702_v0 }
 0x7de   :  { %3484 = vmatpush3.msra.mxu1 %v2031_v56 }
 0x7df   :  { %3485 = vmatprep.subr.mxu1 %v3702_v0 }
 0x7e0   :  { %3486 = vmatpush3.msra.mxu1 %v2030_v60 }
 0x7e1   :  { %3487 = vmatprep.subr.mxu1 %v3702_v0 }
 0x7e2   :  { %3488 = vmatpush3.msra.mxu1 %v2029_v15 }
 0x7e3   :  { %3489 = vmatprep.subr.mxu1 %v3702_v0 }
 0x7e4   :  { %3490 = vmatpush3.msra.mxu1 %v2028_v17 }
 0x7e5   :  { %3491 = vmatprep.subr.mxu1 %v3702_v0 }
 0x7e6   :  { %3492 = vmatpush3.msra.mxu1 %v2027_v30 }
 0x7e7   :  { %3493 = vmatprep.subr.mxu1 %v3702_v0 }
 0x7e8   :  { %3494 = vmatpush3.msra.mxu1 %v2026_v51 }
 0x86b   :  { %v2020_v34 = vpop.f32.mrf.mxu0 }
 0x86d   :  { %v3462_v23 = vpop.f32.mrf.mxu0 }
 0x889   :  { %v1950_v63 = vpop.f32.mrf.mxu1 }
 0x88a   :  { %v1951_v27 = vadd.f32 %v4766_v62, %v1950_v63 }
 0x88b   :  { %v3427_v57 = vpop.f32.mrf.mxu1 }
 0x88c   :  { %v2024_v3 = vadd.f32 %v2020_v34, %v1951_v27 }
 0x88e   :  { %3537 = vtanh.f32 %v2024_v3 }
 0x89b   :  { %v3538_v6 = vpop.eup %3537 }
 0x89c   :  { %3496 = vmatmul.mubr.f32.vlgmr.msra.gmra.mxu1 %v3538_v6 }
 0x95c   :  { %v2115_v10 = vpop.f32.mrf.mxu1 }
 0x95d   :  { %v2116_v12 = vadd.f32 %v2129_v8, %v2115_v10 }
 0x95e   :  { %v3497_v14 = vpop.f32.mrf.mxu1 }
 0x95f   :  { %2119 = vst [vmem:[%s4908_s9] sm:$0xff] %v2116_v12 }
 0x960   :  { %2124 = vsyncpa [#allocation4], 1 }
 0x961   :  { %2125 = vsyncpa [#allocation6], 1 }
 0x962   :  { %2126 = vsyncpa [#allocation9], 1 }

</bundles_post_ra>
